<compile_context>
chip_gen: v6e
topology: v6e:2x2x1
jax: 0.10.0
libtpu: 0.0.40
codegen_flags: <defaults>
</compile_context>

<pallas_src>
import functools

import jax
import jax.numpy as jnp
import numpy as np
from jax import lax
from jax.experimental import pallas as pl
from jax.experimental.pallas import tpu as pltpu

EPS = 1e-5


# --------------------------------------------------------------------------
# per-tap boundary masks for the flattened-HW spatial shifts (built once)
# --------------------------------------------------------------------------
def _make_tap_masks(H, W):
    """(9, 1, H*W) f32: 1.0 where the shifted source pixel is in bounds."""
    yy, xx = np.meshgrid(np.arange(H), np.arange(W), indexing="ij")
    ms = []
    for ky in range(3):
        for kx in range(3):
            dy, dx = ky - 1, kx - 1
            ok = ((yy + dy >= 0) & (yy + dy < H) &
                  (xx + dx >= 0) & (xx + dx < W))
            ms.append(ok.reshape(-1).astype(np.float32))
    return jnp.asarray(np.stack(ms)[:, None, :])          # (9, 1, HW)


# --------------------------------------------------------------------------
# shared helper: 3x3 SAME conv of one sample, channel-major shift-accumulate
# --------------------------------------------------------------------------
def _conv3x3_cm(x_cm, w_ref, b_ref, mask_ref, W):
    """x_cm     : (Cin, H*W) f32 value (channel-major, lane-dense).
       w_ref    : (9, Cout, Cin) bf16 tap-major weights.
       b_ref    : (Cout, 1) f32 bias.
       mask_ref : (9, 1, H*W) f32 per-tap validity masks.
       returns  : (Cout, H*W) f32 conv output (bias added, pre-BN)."""
    Cin, HW = x_cm.shape
    Cout = w_ref.shape[1]
    acc = jnp.zeros((Cout, HW), jnp.float32)
    for ky in range(3):
        for kx in range(3):
            tap = ky * 3 + kx
            k = (ky - 1) * W + (kx - 1)            # flattened spatial shift
            if k == 0:                             # centre tap: identity, mask==1
                shifted = x_cm
            else:
                # out[p] = x[p + k] (lane rotate on the XLU), boundary pixels zeroed
                shifted = pltpu.roll(x_cm, shift=(-k) % HW, axis=1) * mask_ref[tap]
            acc = acc + jnp.dot(w_ref[tap], shifted.astype(jnp.bfloat16),
                                preferred_element_type=jnp.float32)
    return acc + b_ref[...]


# --------------------------------------------------------------------------
# pass 1: conv1 -> z1 (channel-major, bf16) + per-sample BN1 partials
# --------------------------------------------------------------------------
def _conv1_kernel(x_ref, w_ref, b_ref, mask_ref, z_ref, sum_ref, ssq_ref, *, W):
    # x_ref : (1, Cin, HW) f32    z_ref : (1, Cmid, HW) bf16
    Cmid = w_ref.shape[1]
    z = _conv3x3_cm(x_ref[0], w_ref, b_ref, mask_ref, W)          # (Cmid, HW) f32
    sum_ref[...] = jnp.sum(z, axis=1, keepdims=True).reshape(1, Cmid, 1)
    ssq_ref[...] = jnp.sum(z * z, axis=1, keepdims=True).reshape(1, Cmid, 1)
    z_ref[...] = z.astype(z_ref.dtype).reshape(1, Cmid, z.shape[1])


# --------------------------------------------------------------------------
# pass 2: BN1 affine + ReLU + conv2 -> z2 (f32) + per-sample BN2 partials
# --------------------------------------------------------------------------
def _bn1_conv2_kernel(z1_ref, s1_ref, t1_ref, w_ref, b_ref, mask_ref,
                      z2_ref, sum_ref, ssq_ref, *, W):
    # z1_ref : (1, Cmid, HW) bf16   s1_ref/t1_ref : (Cmid, 1) f32 BN1 scale/shift
    Cout = w_ref.shape[1]
    y1 = jnp.maximum(z1_ref[0].astype(jnp.float32) * s1_ref[...] + t1_ref[...],
                     0.0)                                          # (Cmid, HW)
    z2 = _conv3x3_cm(y1, w_ref, b_ref, mask_ref, W)                # (Cout, HW) f32
    sum_ref[...] = jnp.sum(z2, axis=1, keepdims=True).reshape(1, Cout, 1)
    ssq_ref[...] = jnp.sum(z2 * z2, axis=1, keepdims=True).reshape(1, Cout, 1)
    z2_ref[...] = z2.reshape(1, Cout, z2.shape[1])


# --------------------------------------------------------------------------
# BN finalize: one-pass stats -> per-channel scale / shift (tiny JAX math)
# --------------------------------------------------------------------------
def _bn_scale_shift(psum, pssq, gamma, beta, count):
    mean = jnp.sum(psum, axis=(0, 2)) / count       # (C,)
    ex2 = jnp.sum(pssq, axis=(0, 2)) / count
    var = ex2 - mean * mean
    scale = gamma * lax.rsqrt(var + EPS)
    shift = beta - mean * scale
    return scale, shift


# --------------------------------------------------------------------------
# wrapper
# --------------------------------------------------------------------------
@jax.jit
def vgg_block_pallas(x_nchw, params):
    """x_nchw: (N, Cin, H, W) f32 -> (N, Cout, H, W) f32 (PyTorch forward)."""
    w1, b1, g1, be1, w2, b2, g2, be2 = params
    N, Cin, H, W = x_nchw.shape
    Cmid, Cout = w1.shape[0], w2.shape[0]
    HW = H * W
    count = float(N * HW)

    # NCHW is already channel-major: flattening H,W is a free metadata reshape.
    x_cm = x_nchw.reshape(N, Cin, HW)

    # OIHW -> tap-major (9, Cout, Cin) bf16 weight stacks for the MXU.
    w1t = jnp.transpose(w1, (2, 3, 0, 1)).reshape(9, Cmid, Cin).astype(jnp.bfloat16)
    w2t = jnp.transpose(w2, (2, 3, 0, 1)).reshape(9, Cout, Cmid).astype(jnp.bfloat16)

    mask = _make_tap_masks(H, W)                    # (9, 1, HW) f32, constant

    grid = (N,)
    cparams = pltpu.CompilerParams(dimension_semantics=("parallel",),
                                   vmem_limit_bytes=32 * 1024 * 1024)

    # ---- pass 1: conv1 ----
    z1, ps1, pq1 = pl.pallas_call(
        functools.partial(_conv1_kernel, W=W),
        out_shape=(jax.ShapeDtypeStruct((N, Cmid, HW), jnp.bfloat16),
                   jax.ShapeDtypeStruct((N, Cmid, 1), jnp.float32),
                   jax.ShapeDtypeStruct((N, Cmid, 1), jnp.float32)),
        grid_spec=pltpu.PrefetchScalarGridSpec(
            num_scalar_prefetch=0, grid=grid,
            in_specs=[pl.BlockSpec((1, Cin, HW), lambda i: (i, 0, 0)),
                      pl.BlockSpec((9, Cmid, Cin), lambda i: (0, 0, 0)),
                      pl.BlockSpec((Cmid, 1), lambda i: (0, 0)),
                      pl.BlockSpec((9, 1, HW), lambda i: (0, 0, 0))],
            out_specs=(pl.BlockSpec((1, Cmid, HW), lambda i: (i, 0, 0)),
                       pl.BlockSpec((1, Cmid, 1), lambda i: (i, 0, 0)),
                       pl.BlockSpec((1, Cmid, 1), lambda i: (i, 0, 0)))),
        compiler_params=cparams,
    )(x_cm, w1t, b1.reshape(Cmid, 1), mask)

    scale1, shift1 = _bn_scale_shift(ps1, pq1, g1, be1, count)

    # ---- pass 2: BN1 + ReLU + conv2 ----
    z2, ps2, pq2 = pl.pallas_call(
        functools.partial(_bn1_conv2_kernel, W=W),
        out_shape=(jax.ShapeDtypeStruct((N, Cout, HW), jnp.float32),
                   jax.ShapeDtypeStruct((N, Cout, 1), jnp.float32),
                   jax.ShapeDtypeStruct((N, Cout, 1), jnp.float32)),
        grid_spec=pltpu.PrefetchScalarGridSpec(
            num_scalar_prefetch=0, grid=grid,
            in_specs=[pl.BlockSpec((1, Cmid, HW), lambda i: (i, 0, 0)),
                      pl.BlockSpec((Cmid, 1), lambda i: (0, 0)),
                      pl.BlockSpec((Cmid, 1), lambda i: (0, 0)),
                      pl.BlockSpec((9, Cout, Cmid), lambda i: (0, 0, 0)),
                      pl.BlockSpec((Cout, 1), lambda i: (0, 0)),
                      pl.BlockSpec((9, 1, HW), lambda i: (0, 0, 0))],
            out_specs=(pl.BlockSpec((1, Cout, HW), lambda i: (i, 0, 0)),
                       pl.BlockSpec((1, Cout, 1), lambda i: (i, 0, 0)),
                       pl.BlockSpec((1, Cout, 1), lambda i: (i, 0, 0)))),
        compiler_params=cparams,
    )(z1, scale1.reshape(Cmid, 1), shift1.reshape(Cmid, 1),
      w2t, b2.reshape(Cout, 1), mask)

    # ---- BN2 + ReLU epilogue: trivial elementwise, left to XLA fusion ----
    scale2, shift2 = _bn_scale_shift(ps2, pq2, g2, be2, count)
    out = jnp.maximum(z2 * scale2[None, :, None] + shift2[None, :, None], 0.0)

    # channel-major (N, Cout, H*W) reshapes straight to NCHW -- no transpose.
    return out.reshape(N, Cout, H, W)


# --------------------------------------------------------------------------
# pure-JAX reference (mirrors PyTorch training-mode forward)
# --------------------------------------------------------------------------
def vgg_block_reference(x_nchw, params):
    w1, b1, g1, be1, w2, b2, g2, be2 = params

    def conv_bn_relu(x, w, b, g, be):
        out = lax.conv_general_dilated(
            x, w, window_strides=(1, 1), padding="SAME",
            dimension_numbers=("NCHW", "OIHW", "NCHW"),
            precision=lax.Precision.HIGHEST)
        out = out + b[None, :, None, None]
        m = out.mean(axis=(0, 2, 3), keepdims=True)
        v = ((out - m) ** 2).mean(axis=(0, 2, 3), keepdims=True)
        out = (out - m) / jnp.sqrt(v + EPS)
        out = out * g[None, :, None, None] + be[None, :, None, None]
        return jnp.maximum(out, 0.0)

    out = conv_bn_relu(x_nchw, w1, b1, g1, be1)
    out = conv_bn_relu(out, w2, b2, g2, be2)
    return out


if __name__ == "__main__":
    N, Cin, Cmid, Cout, H, W = 2, 4, 8, 8, 16, 16

    key = jax.random.PRNGKey(0)
    ks = jax.random.split(key, 9)
    x = jax.random.normal(ks[0], (N, Cin, H, W), jnp.float32)

    # PyTorch-shaped parameters: OIHW conv weights, per-channel bias/gamma/beta.
    w1 = 0.1 * jax.random.normal(ks[1], (Cmid, Cin, 3, 3), jnp.float32)
    b1 = 0.1 * jax.random.normal(ks[2], (Cmid,), jnp.float32)
    g1 = 1.0 + 0.1 * jax.random.normal(ks[3], (Cmid,), jnp.float32)
    be1 = 0.1 * jax.random.normal(ks[4], (Cmid,), jnp.float32)
    w2 = 0.1 * jax.random.normal(ks[5], (Cout, Cmid, 3, 3), jnp.float32)
    b2 = 0.1 * jax.random.normal(ks[6], (Cout,), jnp.float32)
    g2 = 1.0 + 0.1 * jax.random.normal(ks[7], (Cout,), jnp.float32)
    be2 = 0.1 * jax.random.normal(ks[8], (Cout,), jnp.float32)
    params = (w1, b1, g1, be1, w2, b2, g2, be2)

    out = jax.block_until_ready(vgg_block_pallas(x, params))
    ref = jax.block_until_ready(vgg_block_reference(x, params))

    assert out.shape == (N, Cout, H, W), out.shape
    # bf16 MXU operands + bf16 inter-pass intermediate, f32 accumulation ->
    # small numeric drift vs the all-f32 reference.
    np.testing.assert_allclose(np.asarray(out), np.asarray(ref),
                               atol=2e-2, rtol=2e-2)
    print("KERNEL_OK")
</pallas_src>

<mosaic_0001>
module attributes {stable_mosaic.version = 11 : i64} {
  func.func @_conv1_kernel(%arg0: i32, %arg1: memref<1x4x256xf32, #tpu.memory_space<vmem>>, %arg2: memref<9x8x4xbf16, #tpu.memory_space<vmem>>, %arg3: memref<8x1xf32, #tpu.memory_space<vmem>>, %arg4: memref<9x1x256xf32, #tpu.memory_space<vmem>>, %arg5: memref<1x8x256xbf16, #tpu.memory_space<vmem>>, %arg6: memref<1x8x1xf32, #tpu.memory_space<vmem>>, %arg7: memref<1x8x1xf32, #tpu.memory_space<vmem>>) attributes {dimension_semantics = [#tpu.dimension_semantics<parallel>], iteration_bounds = array<i64: 2>, scalar_prefetch = 0 : i64, scratch_operands = 0 : i64, tpu.core_type = #tpu.core_type<tc>, window_params = [{transform_indices = @transform_0, window_bounds = array<i64: 1, 4, 256>}, {pipeline_mode = #tpu.pipeline_mode<synchronous>, transform_indices = @transform_1, window_bounds = array<i64: 9, 8, 4>}, {pipeline_mode = #tpu.pipeline_mode<synchronous>, transform_indices = @transform_2, window_bounds = array<i64: 8, 1>}, {pipeline_mode = #tpu.pipeline_mode<synchronous>, transform_indices = @transform_3, window_bounds = array<i64: 9, 1, 256>}, {transform_indices = @transform_4, window_bounds = array<i64: 1, 8, 256>}, {transform_indices = @transform_5, window_bounds = array<i64: 1, 8, 1>}, {transform_indices = @transform_6, window_bounds = array<i64: 1, 8, 1>}]} {
    %c0 = arith.constant 0 : index
    %c0_0 = arith.constant 0 : index
    %c0_1 = arith.constant 0 : index
    %0 = vector.load %arg1[%c0, %c0_0, %c0_1] : memref<1x4x256xf32, #tpu.memory_space<vmem>>, vector<1x4x256xf32>
    %1 = vector.shape_cast %0 : vector<1x4x256xf32> to vector<4x256xf32>
    %cst = arith.constant 0.000000e+00 : f32
    %2 = vector.broadcast %cst : f32 to vector<8x256xf32>
    %c17_i32 = arith.constant 17 : i32
    %3 = tpu.dynamic_rotate %1 by %c17_i32 dim 1 : vector<4x256xf32>, i32 -> vector<4x256xf32>
    %c0_2 = arith.constant 0 : index
    %c0_3 = arith.constant 0 : index
    %c0_4 = arith.constant 0 : index
    %4 = vector.load %arg4[%c0_2, %c0_3, %c0_4] : memref<9x1x256xf32, #tpu.memory_space<vmem>>, vector<1x1x256xf32>
    %5 = vector.shape_cast %4 : vector<1x1x256xf32> to vector<1x256xf32>
    %6 = vector.broadcast %5 : vector<1x256xf32> to vector<4x256xf32>
    %7 = arith.mulf %3, %6 : vector<4x256xf32>
    %c0_5 = arith.constant 0 : index
    %c0_6 = arith.constant 0 : index
    %c0_7 = arith.constant 0 : index
    %8 = vector.load %arg2[%c0_5, %c0_6, %c0_7] : memref<9x8x4xbf16, #tpu.memory_space<vmem>>, vector<1x8x4xbf16>
    %9 = vector.shape_cast %8 : vector<1x8x4xbf16> to vector<8x4xbf16>
    %10 = arith.truncf %7 : vector<4x256xf32> to vector<4x256xbf16>
    %cst_8 = arith.constant dense<0.000000e+00> : vector<8x256xf32>
    %11 = tpu.matmul %9, %10, %cst_8 {dimension_numbers = #tpu.dot_dimension_numbers<[1], [0], [0], [1], [0, 0, 1, 1], [], []>} : vector<8x4xbf16>, vector<4x256xbf16>, vector<8x256xf32> -> vector<8x256xf32>
    %12 = arith.addf %2, %11 : vector<8x256xf32>
    %c16_i32 = arith.constant 16 : i32
    %13 = tpu.dynamic_rotate %1 by %c16_i32 dim 1 : vector<4x256xf32>, i32 -> vector<4x256xf32>
    %c1 = arith.constant 1 : index
    %c0_9 = arith.constant 0 : index
    %c0_10 = arith.constant 0 : index
    %14 = vector.load %arg4[%c1, %c0_9, %c0_10] : memref<9x1x256xf32, #tpu.memory_space<vmem>>, vector<1x1x256xf32>
    %15 = vector.shape_cast %14 : vector<1x1x256xf32> to vector<1x256xf32>
    %16 = vector.broadcast %15 : vector<1x256xf32> to vector<4x256xf32>
    %17 = arith.mulf %13, %16 : vector<4x256xf32>
    %c1_11 = arith.constant 1 : index
    %c0_12 = arith.constant 0 : index
    %c0_13 = arith.constant 0 : index
    %18 = vector.load %arg2[%c1_11, %c0_12, %c0_13] : memref<9x8x4xbf16, #tpu.memory_space<vmem>>, vector<1x8x4xbf16>
    %19 = vector.shape_cast %18 : vector<1x8x4xbf16> to vector<8x4xbf16>
    %20 = arith.truncf %17 : vector<4x256xf32> to vector<4x256xbf16>
    %cst_14 = arith.constant dense<0.000000e+00> : vector<8x256xf32>
    %21 = tpu.matmul %19, %20, %cst_14 {dimension_numbers = #tpu.dot_dimension_numbers<[1], [0], [0], [1], [0, 0, 1, 1], [], []>} : vector<8x4xbf16>, vector<4x256xbf16>, vector<8x256xf32> -> vector<8x256xf32>
    %22 = arith.addf %12, %21 : vector<8x256xf32>
    %c15_i32 = arith.constant 15 : i32
    %23 = tpu.dynamic_rotate %1 by %c15_i32 dim 1 : vector<4x256xf32>, i32 -> vector<4x256xf32>
    %c2 = arith.constant 2 : index
    %c0_15 = arith.constant 0 : index
    %c0_16 = arith.constant 0 : index
    %24 = vector.load %arg4[%c2, %c0_15, %c0_16] : memref<9x1x256xf32, #tpu.memory_space<vmem>>, vector<1x1x256xf32>
    %25 = vector.shape_cast %24 : vector<1x1x256xf32> to vector<1x256xf32>
    %26 = vector.broadcast %25 : vector<1x256xf32> to vector<4x256xf32>
    %27 = arith.mulf %23, %26 : vector<4x256xf32>
    %c2_17 = arith.constant 2 : index
    %c0_18 = arith.constant 0 : index
    %c0_19 = arith.constant 0 : index
    %28 = vector.load %arg2[%c2_17, %c0_18, %c0_19] : memref<9x8x4xbf16, #tpu.memory_space<vmem>>, vector<1x8x4xbf16>
    %29 = vector.shape_cast %28 : vector<1x8x4xbf16> to vector<8x4xbf16>
    %30 = arith.truncf %27 : vector<4x256xf32> to vector<4x256xbf16>
    %cst_20 = arith.constant dense<0.000000e+00> : vector<8x256xf32>
    %31 = tpu.matmul %29, %30, %cst_20 {dimension_numbers = #tpu.dot_dimension_numbers<[1], [0], [0], [1], [0, 0, 1, 1], [], []>} : vector<8x4xbf16>, vector<4x256xbf16>, vector<8x256xf32> -> vector<8x256xf32>
    %32 = arith.addf %22, %31 : vector<8x256xf32>
    %c1_i32 = arith.constant 1 : i32
    %33 = tpu.dynamic_rotate %1 by %c1_i32 dim 1 : vector<4x256xf32>, i32 -> vector<4x256xf32>
    %c3 = arith.constant 3 : index
    %c0_21 = arith.constant 0 : index
    %c0_22 = arith.constant 0 : index
    %34 = vector.load %arg4[%c3, %c0_21, %c0_22] : memref<9x1x256xf32, #tpu.memory_space<vmem>>, vector<1x1x256xf32>
    %35 = vector.shape_cast %34 : vector<1x1x256xf32> to vector<1x256xf32>
    %36 = vector.broadcast %35 : vector<1x256xf32> to vector<4x256xf32>
    %37 = arith.mulf %33, %36 : vector<4x256xf32>
    %c3_23 = arith.constant 3 : index
    %c0_24 = arith.constant 0 : index
    %c0_25 = arith.constant 0 : index
    %38 = vector.load %arg2[%c3_23, %c0_24, %c0_25] : memref<9x8x4xbf16, #tpu.memory_space<vmem>>, vector<1x8x4xbf16>
    %39 = vector.shape_cast %38 : vector<1x8x4xbf16> to vector<8x4xbf16>
    %40 = arith.truncf %37 : vector<4x256xf32> to vector<4x256xbf16>
    %cst_26 = arith.constant dense<0.000000e+00> : vector<8x256xf32>
    %41 = tpu.matmul %39, %40, %cst_26 {dimension_numbers = #tpu.dot_dimension_numbers<[1], [0], [0], [1], [0, 0, 1, 1], [], []>} : vector<8x4xbf16>, vector<4x256xbf16>, vector<8x256xf32> -> vector<8x256xf32>
    %42 = arith.addf %32, %41 : vector<8x256xf32>
    %c4 = arith.constant 4 : index
    %c0_27 = arith.constant 0 : index
    %c0_28 = arith.constant 0 : index
    %43 = vector.load %arg2[%c4, %c0_27, %c0_28] : memref<9x8x4xbf16, #tpu.memory_space<vmem>>, vector<1x8x4xbf16>
    %44 = vector.shape_cast %43 : vector<1x8x4xbf16> to vector<8x4xbf16>
    %45 = arith.truncf %1 : vector<4x256xf32> to vector<4x256xbf16>
    %cst_29 = arith.constant dense<0.000000e+00> : vector<8x256xf32>
    %46 = tpu.matmul %44, %45, %cst_29 {dimension_numbers = #tpu.dot_dimension_numbers<[1], [0], [0], [1], [0, 0, 1, 1], [], []>} : vector<8x4xbf16>, vector<4x256xbf16>, vector<8x256xf32> -> vector<8x256xf32>
    %47 = arith.addf %42, %46 : vector<8x256xf32>
    %c255_i32 = arith.constant 255 : i32
    %48 = tpu.dynamic_rotate %1 by %c255_i32 dim 1 : vector<4x256xf32>, i32 -> vector<4x256xf32>
    %c5 = arith.constant 5 : index
    %c0_30 = arith.constant 0 : index
    %c0_31 = arith.constant 0 : index
    %49 = vector.load %arg4[%c5, %c0_30, %c0_31] : memref<9x1x256xf32, #tpu.memory_space<vmem>>, vector<1x1x256xf32>
    %50 = vector.shape_cast %49 : vector<1x1x256xf32> to vector<1x256xf32>
    %51 = vector.broadcast %50 : vector<1x256xf32> to vector<4x256xf32>
    %52 = arith.mulf %48, %51 : vector<4x256xf32>
    %c5_32 = arith.constant 5 : index
    %c0_33 = arith.constant 0 : index
    %c0_34 = arith.constant 0 : index
    %53 = vector.load %arg2[%c5_32, %c0_33, %c0_34] : memref<9x8x4xbf16, #tpu.memory_space<vmem>>, vector<1x8x4xbf16>
    %54 = vector.shape_cast %53 : vector<1x8x4xbf16> to vector<8x4xbf16>
    %55 = arith.truncf %52 : vector<4x256xf32> to vector<4x256xbf16>
    %cst_35 = arith.constant dense<0.000000e+00> : vector<8x256xf32>
    %56 = tpu.matmul %54, %55, %cst_35 {dimension_numbers = #tpu.dot_dimension_numbers<[1], [0], [0], [1], [0, 0, 1, 1], [], []>} : vector<8x4xbf16>, vector<4x256xbf16>, vector<8x256xf32> -> vector<8x256xf32>
    %57 = arith.addf %47, %56 : vector<8x256xf32>
    %c241_i32 = arith.constant 241 : i32
    %58 = tpu.dynamic_rotate %1 by %c241_i32 dim 1 : vector<4x256xf32>, i32 -> vector<4x256xf32>
    %c6 = arith.constant 6 : index
    %c0_36 = arith.constant 0 : index
    %c0_37 = arith.constant 0 : index
    %59 = vector.load %arg4[%c6, %c0_36, %c0_37] : memref<9x1x256xf32, #tpu.memory_space<vmem>>, vector<1x1x256xf32>
    %60 = vector.shape_cast %59 : vector<1x1x256xf32> to vector<1x256xf32>
    %61 = vector.broadcast %60 : vector<1x256xf32> to vector<4x256xf32>
    %62 = arith.mulf %58, %61 : vector<4x256xf32>
    %c6_38 = arith.constant 6 : index
    %c0_39 = arith.constant 0 : index
    %c0_40 = arith.constant 0 : index
    %63 = vector.load %arg2[%c6_38, %c0_39, %c0_40] : memref<9x8x4xbf16, #tpu.memory_space<vmem>>, vector<1x8x4xbf16>
    %64 = vector.shape_cast %63 : vector<1x8x4xbf16> to vector<8x4xbf16>
    %65 = arith.truncf %62 : vector<4x256xf32> to vector<4x256xbf16>
    %cst_41 = arith.constant dense<0.000000e+00> : vector<8x256xf32>
    %66 = tpu.matmul %64, %65, %cst_41 {dimension_numbers = #tpu.dot_dimension_numbers<[1], [0], [0], [1], [0, 0, 1, 1], [], []>} : vector<8x4xbf16>, vector<4x256xbf16>, vector<8x256xf32> -> vector<8x256xf32>
    %67 = arith.addf %57, %66 : vector<8x256xf32>
    %c240_i32 = arith.constant 240 : i32
    %68 = tpu.dynamic_rotate %1 by %c240_i32 dim 1 : vector<4x256xf32>, i32 -> vector<4x256xf32>
    %c7 = arith.constant 7 : index
    %c0_42 = arith.constant 0 : index
    %c0_43 = arith.constant 0 : index
    %69 = vector.load %arg4[%c7, %c0_42, %c0_43] : memref<9x1x256xf32, #tpu.memory_space<vmem>>, vector<1x1x256xf32>
    %70 = vector.shape_cast %69 : vector<1x1x256xf32> to vector<1x256xf32>
    %71 = vector.broadcast %70 : vector<1x256xf32> to vector<4x256xf32>
    %72 = arith.mulf %68, %71 : vector<4x256xf32>
    %c7_44 = arith.constant 7 : index
    %c0_45 = arith.constant 0 : index
    %c0_46 = arith.constant 0 : index
    %73 = vector.load %arg2[%c7_44, %c0_45, %c0_46] : memref<9x8x4xbf16, #tpu.memory_space<vmem>>, vector<1x8x4xbf16>
    %74 = vector.shape_cast %73 : vector<1x8x4xbf16> to vector<8x4xbf16>
    %75 = arith.truncf %72 : vector<4x256xf32> to vector<4x256xbf16>
    %cst_47 = arith.constant dense<0.000000e+00> : vector<8x256xf32>
    %76 = tpu.matmul %74, %75, %cst_47 {dimension_numbers = #tpu.dot_dimension_numbers<[1], [0], [0], [1], [0, 0, 1, 1], [], []>} : vector<8x4xbf16>, vector<4x256xbf16>, vector<8x256xf32> -> vector<8x256xf32>
    %77 = arith.addf %67, %76 : vector<8x256xf32>
    %c239_i32 = arith.constant 239 : i32
    %78 = tpu.dynamic_rotate %1 by %c239_i32 dim 1 : vector<4x256xf32>, i32 -> vector<4x256xf32>
    %c8 = arith.constant 8 : index
    %c0_48 = arith.constant 0 : index
    %c0_49 = arith.constant 0 : index
    %79 = vector.load %arg4[%c8, %c0_48, %c0_49] : memref<9x1x256xf32, #tpu.memory_space<vmem>>, vector<1x1x256xf32>
    %80 = vector.shape_cast %79 : vector<1x1x256xf32> to vector<1x256xf32>
    %81 = vector.broadcast %80 : vector<1x256xf32> to vector<4x256xf32>
    %82 = arith.mulf %78, %81 : vector<4x256xf32>
    %c8_50 = arith.constant 8 : index
    %c0_51 = arith.constant 0 : index
    %c0_52 = arith.constant 0 : index
    %83 = vector.load %arg2[%c8_50, %c0_51, %c0_52] : memref<9x8x4xbf16, #tpu.memory_space<vmem>>, vector<1x8x4xbf16>
    %84 = vector.shape_cast %83 : vector<1x8x4xbf16> to vector<8x4xbf16>
    %85 = arith.truncf %82 : vector<4x256xf32> to vector<4x256xbf16>
    %cst_53 = arith.constant dense<0.000000e+00> : vector<8x256xf32>
    %86 = tpu.matmul %84, %85, %cst_53 {dimension_numbers = #tpu.dot_dimension_numbers<[1], [0], [0], [1], [0, 0, 1, 1], [], []>} : vector<8x4xbf16>, vector<4x256xbf16>, vector<8x256xf32> -> vector<8x256xf32>
    %87 = arith.addf %77, %86 : vector<8x256xf32>
    %c0_54 = arith.constant 0 : index
    %c0_55 = arith.constant 0 : index
    %88 = vector.load %arg3[%c0_54, %c0_55] : memref<8x1xf32, #tpu.memory_space<vmem>>, vector<8x1xf32>
    %89 = vector.broadcast %88 : vector<8x1xf32> to vector<8x256xf32>
    %90 = arith.addf %87, %89 : vector<8x256xf32>
    %cst_56 = arith.constant dense<0.000000e+00> : vector<8xf32>
    %91 = vector.multi_reduction <add>, %90, %cst_56 [1] : vector<8x256xf32> to vector<8xf32>
    %92 = vector.shape_cast %91 : vector<8xf32> to vector<8x1xf32>
    %93 = vector.shape_cast %92 : vector<8x1xf32> to vector<1x8x1xf32>
    %c0_57 = arith.constant 0 : index
    %c0_58 = arith.constant 0 : index
    %c0_59 = arith.constant 0 : index
    %94 = vector.load %arg6[%c0_57, %c0_58, %c0_59] : memref<1x8x1xf32, #tpu.memory_space<vmem>>, vector<1x8x1xf32>
    tpu.vector_store %arg6[%c0_57, %c0_58, %c0_59], %93 {strides = array<i32>} : memref<1x8x1xf32, #tpu.memory_space<vmem>>, vector<1x8x1xf32>,
    %95 = arith.mulf %90, %90 : vector<8x256xf32>
    %cst_60 = arith.constant dense<0.000000e+00> : vector<8xf32>
    %96 = vector.multi_reduction <add>, %95, %cst_60 [1] : vector<8x256xf32> to vector<8xf32>
    %97 = vector.shape_cast %96 : vector<8xf32> to vector<8x1xf32>
    %98 = vector.shape_cast %97 : vector<8x1xf32> to vector<1x8x1xf32>
    %c0_61 = arith.constant 0 : index
    %c0_62 = arith.constant 0 : index
    %c0_63 = arith.constant 0 : index
    %99 = vector.load %arg7[%c0_61, %c0_62, %c0_63] : memref<1x8x1xf32, #tpu.memory_space<vmem>>, vector<1x8x1xf32>
    tpu.vector_store %arg7[%c0_61, %c0_62, %c0_63], %98 {strides = array<i32>} : memref<1x8x1xf32, #tpu.memory_space<vmem>>, vector<1x8x1xf32>,
    %100 = arith.truncf %90 : vector<8x256xf32> to vector<8x256xbf16>
    %101 = vector.shape_cast %100 : vector<8x256xbf16> to vector<1x8x256xbf16>
    %c0_64 = arith.constant 0 : index
    %c0_65 = arith.constant 0 : index
    %c0_66 = arith.constant 0 : index
    %102 = vector.load %arg5[%c0_64, %c0_65, %c0_66] : memref<1x8x256xbf16, #tpu.memory_space<vmem>>, vector<1x8x256xbf16>
    tpu.vector_store %arg5[%c0_64, %c0_65, %c0_66], %101 {strides = array<i32>} : memref<1x8x256xbf16, #tpu.memory_space<vmem>>, vector<1x8x256xbf16>,
    return
  }
  func.func @transform_0(%arg0: i32) -> (i32, i32, i32) {
    %c0_i32 = arith.constant 0 : i32
    %c0_i32_0 = arith.constant 0 : i32
    %c0_i32_1 = arith.constant 0 : i32
    return %arg0, %c0_i32, %c0_i32_0 : i32, i32, i32
  }
  func.func @transform_1(%arg0: i32) -> (i32, i32, i32) {
    %c0_i32 = arith.constant 0 : i32
    %c0_i32_0 = arith.constant 0 : i32
    %c0_i32_1 = arith.constant 0 : i32
    %c0_i32_2 = arith.constant 0 : i32
    return %c0_i32, %c0_i32_0, %c0_i32_1 : i32, i32, i32
  }
  func.func @transform_2(%arg0: i32) -> (i32, i32) {
    %c0_i32 = arith.constant 0 : i32
    %c0_i32_0 = arith.constant 0 : i32
    %c0_i32_1 = arith.constant 0 : i32
    return %c0_i32, %c0_i32_0 : i32, i32
  }
  func.func @transform_3(%arg0: i32) -> (i32, i32, i32) {
    %c0_i32 = arith.constant 0 : i32
    %c0_i32_0 = arith.constant 0 : i32
    %c0_i32_1 = arith.constant 0 : i32
    %c0_i32_2 = arith.constant 0 : i32
    return %c0_i32, %c0_i32_0, %c0_i32_1 : i32, i32, i32
  }
  func.func @transform_4(%arg0: i32) -> (i32, i32, i32) {
    %c0_i32 = arith.constant 0 : i32
    %c0_i32_0 = arith.constant 0 : i32
    %c0_i32_1 = arith.constant 0 : i32
    return %arg0, %c0_i32, %c0_i32_0 : i32, i32, i32
  }
  func.func @transform_5(%arg0: i32) -> (i32, i32, i32) {
    %c0_i32 = arith.constant 0 : i32
    %c0_i32_0 = arith.constant 0 : i32
    %c0_i32_1 = arith.constant 0 : i32
    return %arg0, %c0_i32, %c0_i32_0 : i32, i32, i32
  }
  func.func @transform_6(%arg0: i32) -> (i32, i32, i32) {
    %c0_i32 = arith.constant 0 : i32
    %c0_i32_0 = arith.constant 0 : i32
    %c0_i32_1 = arith.constant 0 : i32
    return %arg0, %c0_i32, %c0_i32_0 : i32, i32, i32
  }
}

module attributes {stable_mosaic.version = 11 : i64} {
  func.func @_bn1_conv2_kernel(%arg0: i32, %arg1: memref<1x8x256xbf16, #tpu.memory_space<vmem>>, %arg2: memref<8x1xf32, #tpu.memory_space<vmem>>, %arg3: memref<8x1xf32, #tpu.memory_space<vmem>>, %arg4: memref<9x8x8xbf16, #tpu.memory_space<vmem>>, %arg5: memref<8x1xf32, #tpu.memory_space<vmem>>, %arg6: memref<9x1x256xf32, #tpu.memory_space<vmem>>, %arg7: memref<1x8x256xf32, #tpu.memory_space<vmem>>, %arg8: memref<1x8x1xf32, #tpu.memory_space<vmem>>, %arg9: memref<1x8x1xf32, #tpu.memory_space<vmem>>) attributes {dimension_semantics = [#tpu.dimension_semantics<parallel>], iteration_bounds = array<i64: 2>, scalar_prefetch = 0 : i64, scratch_operands = 0 : i64, tpu.core_type = #tpu.core_type<tc>, window_params = [{transform_indices = @transform_0, window_bounds = array<i64: 1, 8, 256>}, {pipeline_mode = #tpu.pipeline_mode<synchronous>, transform_indices = @transform_1, window_bounds = array<i64: 8, 1>}, {pipeline_mode = #tpu.pipeline_mode<synchronous>, transform_indices = @transform_2, window_bounds = array<i64: 8, 1>}, {pipeline_mode = #tpu.pipeline_mode<synchronous>, transform_indices = @transform_3, window_bounds = array<i64: 9, 8, 8>}, {pipeline_mode = #tpu.pipeline_mode<synchronous>, transform_indices = @transform_4, window_bounds = array<i64: 8, 1>}, {pipeline_mode = #tpu.pipeline_mode<synchronous>, transform_indices = @transform_5, window_bounds = array<i64: 9, 1, 256>}, {transform_indices = @transform_6, window_bounds = array<i64: 1, 8, 256>}, {transform_indices = @transform_7, window_bounds = array<i64: 1, 8, 1>}, {transform_indices = @transform_8, window_bounds = array<i64: 1, 8, 1>}]} {
    %c0 = arith.constant 0 : index
    %c0_0 = arith.constant 0 : index
    %c0_1 = arith.constant 0 : index
    %0 = vector.load %arg1[%c0, %c0_0, %c0_1] : memref<1x8x256xbf16, #tpu.memory_space<vmem>>, vector<1x8x256xbf16>
    %1 = vector.shape_cast %0 : vector<1x8x256xbf16> to vector<8x256xbf16>
    %2 = arith.extf %1 : vector<8x256xbf16> to vector<8x256xf32>
    %c0_2 = arith.constant 0 : index
    %c0_3 = arith.constant 0 : index
    %3 = vector.load %arg2[%c0_2, %c0_3] : memref<8x1xf32, #tpu.memory_space<vmem>>, vector<8x1xf32>
    %4 = vector.broadcast %3 : vector<8x1xf32> to vector<8x256xf32>
    %5 = arith.mulf %2, %4 : vector<8x256xf32>
    %c0_4 = arith.constant 0 : index
    %c0_5 = arith.constant 0 : index
    %6 = vector.load %arg3[%c0_4, %c0_5] : memref<8x1xf32, #tpu.memory_space<vmem>>, vector<8x1xf32>
    %7 = vector.broadcast %6 : vector<8x1xf32> to vector<8x256xf32>
    %8 = arith.addf %5, %7 : vector<8x256xf32>
    %cst = arith.constant 0.000000e+00 : f32
    %9 = vector.broadcast %cst : f32 to vector<8x256xf32>
    %10 = arith.maximumf %8, %9 : vector<8x256xf32>
    %cst_6 = arith.constant 0.000000e+00 : f32
    %11 = vector.broadcast %cst_6 : f32 to vector<8x256xf32>
    %c17_i32 = arith.constant 17 : i32
    %12 = tpu.dynamic_rotate %10 by %c17_i32 dim 1 : vector<8x256xf32>, i32 -> vector<8x256xf32>
    %c0_7 = arith.constant 0 : index
    %c0_8 = arith.constant 0 : index
    %c0_9 = arith.constant 0 : index
    %13 = vector.load %arg6[%c0_7, %c0_8, %c0_9] : memref<9x1x256xf32, #tpu.memory_space<vmem>>, vector<1x1x256xf32>
    %14 = vector.shape_cast %13 : vector<1x1x256xf32> to vector<1x256xf32>
    %15 = vector.broadcast %14 : vector<1x256xf32> to vector<8x256xf32>
    %16 = arith.mulf %12, %15 : vector<8x256xf32>
    %c0_10 = arith.constant 0 : index
    %c0_11 = arith.constant 0 : index
    %c0_12 = arith.constant 0 : index
    %17 = vector.load %arg4[%c0_10, %c0_11, %c0_12] : memref<9x8x8xbf16, #tpu.memory_space<vmem>>, vector<1x8x8xbf16>
    %18 = vector.shape_cast %17 : vector<1x8x8xbf16> to vector<8x8xbf16>
    %19 = arith.truncf %16 : vector<8x256xf32> to vector<8x256xbf16>
    %cst_13 = arith.constant dense<0.000000e+00> : vector<8x256xf32>
    %20 = tpu.matmul %18, %19, %cst_13 {dimension_numbers = #tpu.dot_dimension_numbers<[1], [0], [0], [1], [0, 0, 1, 1], [], []>} : vector<8x8xbf16>, vector<8x256xbf16>, vector<8x256xf32> -> vector<8x256xf32>
    %21 = arith.addf %11, %20 : vector<8x256xf32>
    %c16_i32 = arith.constant 16 : i32
    %22 = tpu.dynamic_rotate %10 by %c16_i32 dim 1 : vector<8x256xf32>, i32 -> vector<8x256xf32>
    %c1 = arith.constant 1 : index
    %c0_14 = arith.constant 0 : index
    %c0_15 = arith.constant 0 : index
    %23 = vector.load %arg6[%c1, %c0_14, %c0_15] : memref<9x1x256xf32, #tpu.memory_space<vmem>>, vector<1x1x256xf32>
    %24 = vector.shape_cast %23 : vector<1x1x256xf32> to vector<1x256xf32>
    %25 = vector.broadcast %24 : vector<1x256xf32> to vector<8x256xf32>
    %26 = arith.mulf %22, %25 : vector<8x256xf32>
    %c1_16 = arith.constant 1 : index
    %c0_17 = arith.constant 0 : index
    %c0_18 = arith.constant 0 : index
    %27 = vector.load %arg4[%c1_16, %c0_17, %c0_18] : memref<9x8x8xbf16, #tpu.memory_space<vmem>>, vector<1x8x8xbf16>
    %28 = vector.shape_cast %27 : vector<1x8x8xbf16> to vector<8x8xbf16>
    %29 = arith.truncf %26 : vector<8x256xf32> to vector<8x256xbf16>
    %cst_19 = arith.constant dense<0.000000e+00> : vector<8x256xf32>
    %30 = tpu.matmul %28, %29, %cst_19 {dimension_numbers = #tpu.dot_dimension_numbers<[1], [0], [0], [1], [0, 0, 1, 1], [], []>} : vector<8x8xbf16>, vector<8x256xbf16>, vector<8x256xf32> -> vector<8x256xf32>
    %31 = arith.addf %21, %30 : vector<8x256xf32>
    %c15_i32 = arith.constant 15 : i32
    %32 = tpu.dynamic_rotate %10 by %c15_i32 dim 1 : vector<8x256xf32>, i32 -> vector<8x256xf32>
    %c2 = arith.constant 2 : index
    %c0_20 = arith.constant 0 : index
    %c0_21 = arith.constant 0 : index
    %33 = vector.load %arg6[%c2, %c0_20, %c0_21] : memref<9x1x256xf32, #tpu.memory_space<vmem>>, vector<1x1x256xf32>
    %34 = vector.shape_cast %33 : vector<1x1x256xf32> to vector<1x256xf32>
    %35 = vector.broadcast %34 : vector<1x256xf32> to vector<8x256xf32>
    %36 = arith.mulf %32, %35 : vector<8x256xf32>
    %c2_22 = arith.constant 2 : index
    %c0_23 = arith.constant 0 : index
    %c0_24 = arith.constant 0 : index
    %37 = vector.load %arg4[%c2_22, %c0_23, %c0_24] : memref<9x8x8xbf16, #tpu.memory_space<vmem>>, vector<1x8x8xbf16>
    %38 = vector.shape_cast %37 : vector<1x8x8xbf16> to vector<8x8xbf16>
    %39 = arith.truncf %36 : vector<8x256xf32> to vector<8x256xbf16>
    %cst_25 = arith.constant dense<0.000000e+00> : vector<8x256xf32>
    %40 = tpu.matmul %38, %39, %cst_25 {dimension_numbers = #tpu.dot_dimension_numbers<[1], [0], [0], [1], [0, 0, 1, 1], [], []>} : vector<8x8xbf16>, vector<8x256xbf16>, vector<8x256xf32> -> vector<8x256xf32>
    %41 = arith.addf %31, %40 : vector<8x256xf32>
    %c1_i32 = arith.constant 1 : i32
    %42 = tpu.dynamic_rotate %10 by %c1_i32 dim 1 : vector<8x256xf32>, i32 -> vector<8x256xf32>
    %c3 = arith.constant 3 : index
    %c0_26 = arith.constant 0 : index
    %c0_27 = arith.constant 0 : index
    %43 = vector.load %arg6[%c3, %c0_26, %c0_27] : memref<9x1x256xf32, #tpu.memory_space<vmem>>, vector<1x1x256xf32>
    %44 = vector.shape_cast %43 : vector<1x1x256xf32> to vector<1x256xf32>
    %45 = vector.broadcast %44 : vector<1x256xf32> to vector<8x256xf32>
    %46 = arith.mulf %42, %45 : vector<8x256xf32>
    %c3_28 = arith.constant 3 : index
    %c0_29 = arith.constant 0 : index
    %c0_30 = arith.constant 0 : index
    %47 = vector.load %arg4[%c3_28, %c0_29, %c0_30] : memref<9x8x8xbf16, #tpu.memory_space<vmem>>, vector<1x8x8xbf16>
    %48 = vector.shape_cast %47 : vector<1x8x8xbf16> to vector<8x8xbf16>
    %49 = arith.truncf %46 : vector<8x256xf32> to vector<8x256xbf16>
    %cst_31 = arith.constant dense<0.000000e+00> : vector<8x256xf32>
    %50 = tpu.matmul %48, %49, %cst_31 {dimension_numbers = #tpu.dot_dimension_numbers<[1], [0], [0], [1], [0, 0, 1, 1], [], []>} : vector<8x8xbf16>, vector<8x256xbf16>, vector<8x256xf32> -> vector<8x256xf32>
    %51 = arith.addf %41, %50 : vector<8x256xf32>
    %c4 = arith.constant 4 : index
    %c0_32 = arith.constant 0 : index
    %c0_33 = arith.constant 0 : index
    %52 = vector.load %arg4[%c4, %c0_32, %c0_33] : memref<9x8x8xbf16, #tpu.memory_space<vmem>>, vector<1x8x8xbf16>
    %53 = vector.shape_cast %52 : vector<1x8x8xbf16> to vector<8x8xbf16>
    %54 = arith.truncf %10 : vector<8x256xf32> to vector<8x256xbf16>
    %cst_34 = arith.constant dense<0.000000e+00> : vector<8x256xf32>
    %55 = tpu.matmul %53, %54, %cst_34 {dimension_numbers = #tpu.dot_dimension_numbers<[1], [0], [0], [1], [0, 0, 1, 1], [], []>} : vector<8x8xbf16>, vector<8x256xbf16>, vector<8x256xf32> -> vector<8x256xf32>
    %56 = arith.addf %51, %55 : vector<8x256xf32>
    %c255_i32 = arith.constant 255 : i32
    %57 = tpu.dynamic_rotate %10 by %c255_i32 dim 1 : vector<8x256xf32>, i32 -> vector<8x256xf32>
    %c5 = arith.constant 5 : index
    %c0_35 = arith.constant 0 : index
    %c0_36 = arith.constant 0 : index
    %58 = vector.load %arg6[%c5, %c0_35, %c0_36] : memref<9x1x256xf32, #tpu.memory_space<vmem>>, vector<1x1x256xf32>
    %59 = vector.shape_cast %58 : vector<1x1x256xf32> to vector<1x256xf32>
    %60 = vector.broadcast %59 : vector<1x256xf32> to vector<8x256xf32>
    %61 = arith.mulf %57, %60 : vector<8x256xf32>
    %c5_37 = arith.constant 5 : index
    %c0_38 = arith.constant 0 : index
    %c0_39 = arith.constant 0 : index
    %62 = vector.load %arg4[%c5_37, %c0_38, %c0_39] : memref<9x8x8xbf16, #tpu.memory_space<vmem>>, vector<1x8x8xbf16>
    %63 = vector.shape_cast %62 : vector<1x8x8xbf16> to vector<8x8xbf16>
    %64 = arith.truncf %61 : vector<8x256xf32> to vector<8x256xbf16>
    %cst_40 = arith.constant dense<0.000000e+00> : vector<8x256xf32>
    %65 = tpu.matmul %63, %64, %cst_40 {dimension_numbers = #tpu.dot_dimension_numbers<[1], [0], [0], [1], [0, 0, 1, 1], [], []>} : vector<8x8xbf16>, vector<8x256xbf16>, vector<8x256xf32> -> vector<8x256xf32>
    %66 = arith.addf %56, %65 : vector<8x256xf32>
    %c241_i32 = arith.constant 241 : i32
    %67 = tpu.dynamic_rotate %10 by %c241_i32 dim 1 : vector<8x256xf32>, i32 -> vector<8x256xf32>
    %c6 = arith.constant 6 : index
    %c0_41 = arith.constant 0 : index
    %c0_42 = arith.constant 0 : index
    %68 = vector.load %arg6[%c6, %c0_41, %c0_42] : memref<9x1x256xf32, #tpu.memory_space<vmem>>, vector<1x1x256xf32>
    %69 = vector.shape_cast %68 : vector<1x1x256xf32> to vector<1x256xf32>
    %70 = vector.broadcast %69 : vector<1x256xf32> to vector<8x256xf32>
    %71 = arith.mulf %67, %70 : vector<8x256xf32>
    %c6_43 = arith.constant 6 : index
    %c0_44 = arith.constant 0 : index
    %c0_45 = arith.constant 0 : index
    %72 = vector.load %arg4[%c6_43, %c0_44, %c0_45] : memref<9x8x8xbf16, #tpu.memory_space<vmem>>, vector<1x8x8xbf16>
    %73 = vector.shape_cast %72 : vector<1x8x8xbf16> to vector<8x8xbf16>
    %74 = arith.truncf %71 : vector<8x256xf32> to vector<8x256xbf16>
    %cst_46 = arith.constant dense<0.000000e+00> : vector<8x256xf32>
    %75 = tpu.matmul %73, %74, %cst_46 {dimension_numbers = #tpu.dot_dimension_numbers<[1], [0], [0], [1], [0, 0, 1, 1], [], []>} : vector<8x8xbf16>, vector<8x256xbf16>, vector<8x256xf32> -> vector<8x256xf32>
    %76 = arith.addf %66, %75 : vector<8x256xf32>
    %c240_i32 = arith.constant 240 : i32
    %77 = tpu.dynamic_rotate %10 by %c240_i32 dim 1 : vector<8x256xf32>, i32 -> vector<8x256xf32>
    %c7 = arith.constant 7 : index
    %c0_47 = arith.constant 0 : index
    %c0_48 = arith.constant 0 : index
    %78 = vector.load %arg6[%c7, %c0_47, %c0_48] : memref<9x1x256xf32, #tpu.memory_space<vmem>>, vector<1x1x256xf32>
    %79 = vector.shape_cast %78 : vector<1x1x256xf32> to vector<1x256xf32>
    %80 = vector.broadcast %79 : vector<1x256xf32> to vector<8x256xf32>
    %81 = arith.mulf %77, %80 : vector<8x256xf32>
    %c7_49 = arith.constant 7 : index
    %c0_50 = arith.constant 0 : index
    %c0_51 = arith.constant 0 : index
    %82 = vector.load %arg4[%c7_49, %c0_50, %c0_51] : memref<9x8x8xbf16, #tpu.memory_space<vmem>>, vector<1x8x8xbf16>
    %83 = vector.shape_cast %82 : vector<1x8x8xbf16> to vector<8x8xbf16>
    %84 = arith.truncf %81 : vector<8x256xf32> to vector<8x256xbf16>
    %cst_52 = arith.constant dense<0.000000e+00> : vector<8x256xf32>
    %85 = tpu.matmul %83, %84, %cst_52 {dimension_numbers = #tpu.dot_dimension_numbers<[1], [0], [0], [1], [0, 0, 1, 1], [], []>} : vector<8x8xbf16>, vector<8x256xbf16>, vector<8x256xf32> -> vector<8x256xf32>
    %86 = arith.addf %76, %85 : vector<8x256xf32>
    %c239_i32 = arith.constant 239 : i32
    %87 = tpu.dynamic_rotate %10 by %c239_i32 dim 1 : vector<8x256xf32>, i32 -> vector<8x256xf32>
    %c8 = arith.constant 8 : index
    %c0_53 = arith.constant 0 : index
    %c0_54 = arith.constant 0 : index
    %88 = vector.load %arg6[%c8, %c0_53, %c0_54] : memref<9x1x256xf32, #tpu.memory_space<vmem>>, vector<1x1x256xf32>
    %89 = vector.shape_cast %88 : vector<1x1x256xf32> to vector<1x256xf32>
    %90 = vector.broadcast %89 : vector<1x256xf32> to vector<8x256xf32>
    %91 = arith.mulf %87, %90 : vector<8x256xf32>
    %c8_55 = arith.constant 8 : index
    %c0_56 = arith.constant 0 : index
    %c0_57 = arith.constant 0 : index
    %92 = vector.load %arg4[%c8_55, %c0_56, %c0_57] : memref<9x8x8xbf16, #tpu.memory_space<vmem>>, vector<1x8x8xbf16>
    %93 = vector.shape_cast %92 : vector<1x8x8xbf16> to vector<8x8xbf16>
    %94 = arith.truncf %91 : vector<8x256xf32> to vector<8x256xbf16>
    %cst_58 = arith.constant dense<0.000000e+00> : vector<8x256xf32>
    %95 = tpu.matmul %93, %94, %cst_58 {dimension_numbers = #tpu.dot_dimension_numbers<[1], [0], [0], [1], [0, 0, 1, 1], [], []>} : vector<8x8xbf16>, vector<8x256xbf16>, vector<8x256xf32> -> vector<8x256xf32>
    %96 = arith.addf %86, %95 : vector<8x256xf32>
    %c0_59 = arith.constant 0 : index
    %c0_60 = arith.constant 0 : index
    %97 = vector.load %arg5[%c0_59, %c0_60] : memref<8x1xf32, #tpu.memory_space<vmem>>, vector<8x1xf32>
    %98 = vector.broadcast %97 : vector<8x1xf32> to vector<8x256xf32>
    %99 = arith.addf %96, %98 : vector<8x256xf32>
    %cst_61 = arith.constant dense<0.000000e+00> : vector<8xf32>
    %100 = vector.multi_reduction <add>, %99, %cst_61 [1] : vector<8x256xf32> to vector<8xf32>
    %101 = vector.shape_cast %100 : vector<8xf32> to vector<8x1xf32>
    %102 = vector.shape_cast %101 : vector<8x1xf32> to vector<1x8x1xf32>
    %c0_62 = arith.constant 0 : index
    %c0_63 = arith.constant 0 : index
    %c0_64 = arith.constant 0 : index
    %103 = vector.load %arg8[%c0_62, %c0_63, %c0_64] : memref<1x8x1xf32, #tpu.memory_space<vmem>>, vector<1x8x1xf32>
    tpu.vector_store %arg8[%c0_62, %c0_63, %c0_64], %102 {strides = array<i32>} : memref<1x8x1xf32, #tpu.memory_space<vmem>>, vector<1x8x1xf32>,
    %104 = arith.mulf %99, %99 : vector<8x256xf32>
    %cst_65 = arith.constant dense<0.000000e+00> : vector<8xf32>
    %105 = vector.multi_reduction <add>, %104, %cst_65 [1] : vector<8x256xf32> to vector<8xf32>
    %106 = vector.shape_cast %105 : vector<8xf32> to vector<8x1xf32>
    %107 = vector.shape_cast %106 : vector<8x1xf32> to vector<1x8x1xf32>
    %c0_66 = arith.constant 0 : index
    %c0_67 = arith.constant 0 : index
    %c0_68 = arith.constant 0 : index
    %108 = vector.load %arg9[%c0_66, %c0_67, %c0_68] : memref<1x8x1xf32, #tpu.memory_space<vmem>>, vector<1x8x1xf32>
    tpu.vector_store %arg9[%c0_66, %c0_67, %c0_68], %107 {strides = array<i32>} : memref<1x8x1xf32, #tpu.memory_space<vmem>>, vector<1x8x1xf32>,
    %109 = vector.shape_cast %99 : vector<8x256xf32> to vector<1x8x256xf32>
    %c0_69 = arith.constant 0 : index
    %c0_70 = arith.constant 0 : index
    %c0_71 = arith.constant 0 : index
    %110 = vector.load %arg7[%c0_69, %c0_70, %c0_71] : memref<1x8x256xf32, #tpu.memory_space<vmem>>, vector<1x8x256xf32>
    tpu.vector_store %arg7[%c0_69, %c0_70, %c0_71], %109 {strides = array<i32>} : memref<1x8x256xf32, #tpu.memory_space<vmem>>, vector<1x8x256xf32>,
    return
  }
  func.func @transform_0(%arg0: i32) -> (i32, i32, i32) {
    %c0_i32 = arith.constant 0 : i32
    %c0_i32_0 = arith.constant 0 : i32
    %c0_i32_1 = arith.constant 0 : i32
    return %arg0, %c0_i32, %c0_i32_0 : i32, i32, i32
  }
  func.func @transform_1(%arg0: i32) -> (i32, i32) {
    %c0_i32 = arith.constant 0 : i32
    %c0_i32_0 = arith.constant 0 : i32
    %c0_i32_1 = arith.constant 0 : i32
    return %c0_i32, %c0_i32_0 : i32, i32
  }
  func.func @transform_2(%arg0: i32) -> (i32, i32) {
    %c0_i32 = arith.constant 0 : i32
    %c0_i32_0 = arith.constant 0 : i32
    %c0_i32_1 = arith.constant 0 : i32
    return %c0_i32, %c0_i32_0 : i32, i32
  }
  func.func @transform_3(%arg0: i32) -> (i32, i32, i32) {
    %c0_i32 = arith.constant 0 : i32
    %c0_i32_0 = arith.constant 0 : i32
    %c0_i32_1 = arith.constant 0 : i32
    %c0_i32_2 = arith.constant 0 : i32
    return %c0_i32, %c0_i32_0, %c0_i32_1 : i32, i32, i32
  }
  func.func @transform_4(%arg0: i32) -> (i32, i32) {
    %c0_i32 = arith.constant 0 : i32
    %c0_i32_0 = arith.constant 0 : i32
    %c0_i32_1 = arith.constant 0 : i32
    return %c0_i32, %c0_i32_0 : i32, i32
  }
  func.func @transform_5(%arg0: i32) -> (i32, i32, i32) {
    %c0_i32 = arith.constant 0 : i32
    %c0_i32_0 = arith.constant 0 : i32
    %c0_i32_1 = arith.constant 0 : i32
    %c0_i32_2 = arith.constant 0 : i32
    return %c0_i32, %c0_i32_0, %c0_i32_1 : i32, i32, i32
  }
  func.func @transform_6(%arg0: i32) -> (i32, i32, i32) {
    %c0_i32 = arith.constant 0 : i32
    %c0_i32_0 = arith.constant 0 : i32
    %c0_i32_1 = arith.constant 0 : i32
    return %arg0, %c0_i32, %c0_i32_0 : i32, i32, i32
  }
  func.func @transform_7(%arg0: i32) -> (i32, i32, i32) {
    %c0_i32 = arith.constant 0 : i32
    %c0_i32_0 = arith.constant 0 : i32
    %c0_i32_1 = arith.constant 0 : i32
    return %arg0, %c0_i32, %c0_i32_0 : i32, i32, i32
  }
  func.func @transform_8(%arg0: i32) -> (i32, i32, i32) {
    %c0_i32 = arith.constant 0 : i32
    %c0_i32_0 = arith.constant 0 : i32
    %c0_i32_1 = arith.constant 0 : i32
    return %arg0, %c0_i32, %c0_i32_0 : i32, i32, i32
  }
}

</mosaic_0001>

<bundles_post_ra>
// kernel: vgg_block_pallas.2
= control target key start
LH: loop header
LB: loop body
LE: loop exit
PB: predicated region body
PF: predicated region fallthrough
CT: control target
= control target key end

     0   :  { %s1222_s21 = smov 0   ;;  %s1418_s0 = inlined_call_operand.vmem [shape: f32[2,4,256], index: 0, kind: input, shape index: {}]   ;;  %s1419_s1 = inlined_call_operand.vmem [shape: bf16[9,8,4], index: 1, kind: input, shape index: {}]   ;;  %s1420_s2 = inlined_call_operand.vmem [shape: f32[8,1], index: 2, kind: input, shape index: {}]   ;;  %s1421_s3 = inlined_call_operand.vmem [shape: f32[9,1,256], index: 3, kind: input, shape index: {}]   ;;  %s1422_s4 = inlined_call_operand.vmem [shape: bf16[2,8,256], index: 4, kind: output, shape index: {0}]   ;;  %s1423_s5 = inlined_call_operand.vmem [shape: f32[2,8,1], index: 5, kind: output, shape index: {1}]   ;;  %s1424_s6 = inlined_call_operand.vmem [shape: f32[2,8,1], index: 6, kind: output, shape index: {2}]  }
   0x1 LB: > { %s1101_s22 = sadd.s32 4294967295, %s1176_s21   ;;  %p1105_p0 = scmp.ge.s32.totalorder %s1176_s21, 1  ;;  %s1176_s21 = sphi %s1222_s21, %s17_s21  }
   0x2   : > { %p217_p1 = scmp.lt.s32.totalorder %s1176_s21, 3 }
   0x4   : > { %p218_p2 = pnand %p1105_p0, %p217_p1 }
   0x5   : > { %p255_p3 = scmp.lt.s32.totalorder (!%p218_p2), %s1101_s22, 1  ;;  %s1179_s27 = smov (!%p218_p2), 17  }
   0x6   : > { %221 = sbr.rel (%p218_p2) target bundleno = 517 (0x205), region = 36  ;;  %s1180_s28 = smov (!%p218_p2), 16  }
   0x7   : > { %s1181_s29 = smov (!%p218_p2), 15   ;;  %s1182_s30 = smov (!%p218_p2), 1  }
   0x8   : > { %s1183_s7 = smov (!%p218_p2), 127   ;;  %s1184_s8 = smov (!%p218_p2), 113  }
   0x9   : > { %s1185_s9 = smov (!%p218_p2), 112   ;;  %s1186_s10 = smov (!%p218_p2), 111  }
   0xb   : > { %s1426_s22 = smov (!%p255_p3, %s1101_s22), 1  ;;  %v1178_v1 = vmov 0   ;;  %v956_v3 = vld [vmem:[%s1420_s2] sm:$0xff]  ;;  %v282_v4 = vlaneseq  ;;  %vm334_vm3 = vcmask 1041408   ;;  %v1129_v45 = vld [vmem:[%s1421_s3 + $0xa] sm:$0x3] }
   0xc   : > { %s1230_s23 = sshll.u32 %s1426_s22, 3  ;;  %373 = vmatprep.mubr.bf16.mxu0 %v1178_v1  ;;  %423 = vmatprep.mubr.bf16.mxu1 %v1178_v1  ;;  %v287_v9 = vld [vmem:[%s1421_s3] sm:$0x3]  ;;  %v1112_v10 = vld [vmem:[%s1421_s3 + $0x2] sm:$0x3]  ;;  %vm330_vm5 = vcmask 31744  }
   0xd   : > { %s259_s26 = scalar_lea.vmem %s1418_s0, %s1230_s23  ;;  %1168 = vset.pattern.permute.xlu0 %v1178_v1  ;;  %v290_v5 = vshrl.u32 %v282_v4, 7  ;;  %v1264_v6 = vand.u32 127, %v282_v4  ;;  %v1118_v13 = vld [vmem:[%s1421_s3 + $0x4] sm:$0x3]  ;;  %v1122_v30 = vld [vmem:[%s1421_s3 + $0x6] sm:$0x3]  ;;  %s272_s11 = scalar_lea.vmem %s1424_s6, %s1230_s23 }
   0xe   : > { %v1236_v0 = vld [vmem:[%s259_s26] sm:$0xff]  ;;  %v1133_v60 = vld [vmem:[%s1421_s3 + $0xc] sm:$0x3]  ;;  %vm967_vm10 = vcmask 7168  }
   0xf   : > { %278 = vrot.lane.b32.xlu1 %v1236_v0, %s1179_s27  ;;  %304 = vrot.lane.b32.xlu0 %v1236_v0, %s1180_s28  ;;  %v1243_v2 = vcombine.high %v1236_v0, %v1236_v0  ;;  %v1266_v7 = vsub.s32 0, %v290_v5  ;;  %v1268_v8 = vsub.s32 1, %v290_v5  ;;  %vm284_vm0 = vcmp.lt.s32.totalorder %v1264_v6, 17  ;;  %v1113_v46 = vld [vmem:[%s1419_s1 + $0x4] sm:$0xf] }
  0x10   : > { %vm308_vm1 = vcmp.lt.s32.totalorder %v1264_v6, 16  ;;  %vm436_vm2 = vcmp.lt.s32.totalorder %v1264_v6, 15  ;;  %vm514_vm4 = vcmp.lt.s32.totalorder %v1264_v6, 1  ;;  %v301_v47 = vld [vmem:[%s1419_s1] sm:$0xf]  ;;  %vm648_vm6 = vcmp.lt.s32.totalorder %v1264_v6, 127 }
  0x11   : > { %v292_v14 = vrot.slane %v287_v9, %v1266_v7  ;;  %v317_v15 = vrot.slane %v1112_v10, %v1266_v7  ;;  %v321_v16 = vrot.slane %v1112_v10, %v1268_v8  ;;  %v296_v17 = vrot.slane %v287_v9, %v1268_v8 }
  0x12   : > { %v445_v20 = vrot.slane %v1118_v13, %v1266_v7  ;;  %v449_v21 = vrot.slane %v1118_v13, %v1268_v8  ;;  %v523_v39 = vrot.slane %v1122_v30, %v1266_v7  ;;  %v527_v40 = vrot.slane %v1122_v30, %v1268_v8  ;;  %v1137_v13 = vld [vmem:[%s1421_s3 + $0xe] sm:$0x3] }
  0x13   : > { %280 = vrot.lane.b32.xlu1 %v1243_v2, %s1179_s27  ;;  %306 = vrot.lane.b32.xlu0 %v1243_v2, %s1180_s28  ;;  %v657_v54 = vrot.slane %v1129_v45, %v1266_v7  ;;  %v591_v55 = vpack.c.bf16 %v1243_v2, %v1243_v2  ;;  %v661_v59 = vrot.slane %v1129_v45, %v1268_v8  ;;  %vm726_vm7 = vcmp.lt.s32.totalorder %v1264_v6, 113 }
  0x14   : > { %v735_v9 = vrot.slane %v1133_v60, %v1266_v7  ;;  %vm804_vm8 = vcmp.lt.s32.totalorder %v1264_v6, 112  ;;  %vm882_vm9 = vcmp.lt.s32.totalorder %v1264_v6, 111 }
  0x17   : > { %434 = vrot.lane.b32.xlu1 %v1243_v2, %s1181_s29  ;;  %432 = vrot.lane.b32.xlu0 %v1236_v0, %s1181_s29  ;;  %s264_s29 = scalar_lea.vmem %s1422_s4, %s1230_s23 }
  0x1b   : > { %512 = vrot.lane.b32.xlu1 %v1243_v2, %s1182_s30  ;;  %510 = vrot.lane.b32.xlu0 %v1236_v0, %s1182_s30 }
  0x1f   : > { %646 = vrot.lane.b32.xlu1 %v1243_v2, %s1183_s7  ;;  %644 = vrot.lane.b32.xlu0 %v1236_v0, %s1183_s7 }
  0x23   : > { %724 = vrot.lane.b32.xlu1 %v1243_v2, %s1184_s8  ;;  %722 = vrot.lane.b32.xlu0 %v1236_v0, %s1184_s8  ;;  %s268_s8 = scalar_lea.vmem %s1423_s5, %s1230_s23 }
  0x27   : > { %802 = vrot.lane.b32.xlu1 %v1243_v2, %s1185_s9  ;;  %800 = vrot.lane.b32.xlu0 %v1236_v0, %s1185_s9 }
  0x2b   : > { %880 = vrot.lane.b32.xlu1 %v1243_v2, %s1186_s10  ;;  %878 = vrot.lane.b32.xlu0 %v1236_v0, %s1186_s10 }
  0x2f   : > { %959 = vperm.xlu0 %1168, %v956_v3   ;;  %v590_v3 = vpack.c.bf16 %v1236_v0, %v1236_v0  ;;  %v739_v0 = vrot.slane %v1133_v60, %v1268_v8 }
  0x81   : > { %v279_v11 = vpop.permute.xlu1 %278  ;;  %v305_v12 = vpop.permute.xlu0 %304 }
  0x85   : > { %v281_v18 = vpop.permute.xlu1 %280  ;;  %v307_v19 = vpop.permute.xlu0 %306 }
  0x86   : > { %v285_v22 = vsel %vm284_vm0, %v279_v11, %v281_v18  ;;  %v286_v23 = vsel %vm284_vm0, %v281_v18, %v279_v11  ;;  %v309_v24 = vsel %vm308_vm1, %v305_v12, %v307_v19  ;;  %v310_v25 = vsel %vm308_vm1, %v307_v19, %v305_v12 }
  0x87   : > { %v299_v26 = vmul.f32 %v292_v14, %v286_v23  ;;  %v324_v27 = vmul.f32 %v317_v15, %v310_v25  ;;  %v325_v28 = vmul.f32 %v321_v16, %v309_v24  ;;  %v300_v29 = vmul.f32 %v296_v17, %v285_v22  ;;  %v1119_v14 = vld [vmem:[%s1419_s1 + $0x8] sm:$0xf]  ;;  %v1123_v15 = vld [vmem:[%s1419_s1 + $0xc] sm:$0xf] }
  0x88   : > { %v596_v18 = vsel %vm334_vm3, %v590_v3, 0  ;;  %v813_v23 = vrot.slane %v1137_v13, %v1266_v7 }
  0x89   : > { %v435_v31 = vpop.permute.xlu1 %434  ;;  %v433_v32 = vpop.permute.xlu0 %432  ;;  %v329_v33 = vpack.c.bf16 %v325_v28, %v325_v28  ;;  %v303_v34 = vpack.c.bf16 %v300_v29, %v300_v29  ;;  %v328_v35 = vpack.c.bf16 %v324_v27, %v324_v27  ;;  %v302_v36 = vpack.c.bf16 %v299_v26, %v299_v26  ;;  %v1141_v28 = vld [vmem:[%s1421_s3 + $0x10] sm:$0x3] }
  0x8a   : > { %v437_v37 = vsel %vm436_vm2, %v433_v32, %v435_v31  ;;  %v438_v38 = vsel %vm436_vm2, %v435_v31, %v433_v32  ;;  %v817_v27 = vrot.slane %v1137_v13, %v1268_v8 }
  0x8b   : > { %v452_v41 = vmul.f32 %v445_v20, %v438_v38  ;;  %v453_v42 = vmul.f32 %v449_v21, %v437_v37  ;;  %1114 = vmatprep.subr.msk.bf16.mxu0 %vm334_vm3, %v329_v33  ;;  %1116 = vmatprep.subr.msk.bf16.mxu1 %vm334_vm3, %v303_v34  ;;  %v336_v43 = vsel %vm334_vm3, %v328_v35, 0  ;;  %v386_v44 = vsel %vm334_vm3, %v302_v36, 0 }
  0x8c   : > { %356 = vmatpush1.bf16.msra.mxu0 %v336_v43  ;;  %406 = vmatpush1.bf16.msra.mxu1 %v386_v44  ;;  %v891_v37 = vrot.slane %v1141_v28, %v1266_v7  ;;  %v895_v38 = vrot.slane %v1141_v28, %v1268_v8 }
  0x8d   : > { %v456_v48 = vpack.c.bf16 %v452_v41, %v452_v41  ;;  %v457_v49 = vpack.c.bf16 %v453_v42, %v453_v42  ;;  %v513_v50 = vpop.permute.xlu1 %512  ;;  %v511_v51 = vpop.permute.xlu0 %510 }
  0x8e   : > { %v515_v52 = vsel %vm514_vm4, %v511_v51, %v513_v50  ;;  %v516_v53 = vsel %vm514_vm4, %v513_v50, %v511_v51  ;;  %v1134_v50 = vld [vmem:[%s1419_s1 + $0x18] sm:$0xf]  ;;  %v1138_v51 = vld [vmem:[%s1419_s1 + $0x1c] sm:$0xf] }
  0x8f   : > { %v530_v56 = vmul.f32 %v523_v39, %v516_v53  ;;  %v531_v57 = vmul.f32 %v527_v40, %v515_v52  ;;  %1115 = vmatmul.mubr.msk.bf16.vlgmr.msra.gmra.mxu0 %vm330_vm5, %v1113_v46  ;;  %1117 = vmatmul.mubr.msk.bf16.vlgmr.msra.gmra.mxu1 %vm330_vm5, %v301_v47  ;;  %v462_v58 = vsel %vm334_vm3, %v456_v48, 0  ;;  %v1126_v39 = vld [vmem:[%s1419_s1 + $0x10] sm:$0xf]  ;;  %v1130_v40 = vld [vmem:[%s1419_s1 + $0x14] sm:$0xf] }
  0x90   : > { %1120 = vmatprep.subr.msk.bf16.mxu0 %vm334_vm3, %v457_v49  ;;  %499 = vmatprep.mubr.bf16.mxu0 %v1178_v1  ;;  %v1142_v53 = vld [vmem:[%s1419_s1 + $0x20] sm:$0xf] }
  0x91   : > { %v534_v61 = vpack.c.bf16 %v530_v56, %v530_v56  ;;  %v535_v62 = vpack.c.bf16 %v531_v57, %v531_v57  ;;  %482 = vmatpush1.bf16.msra.mxu0 %v462_v58  ;;  %v647_v63 = vpop.permute.xlu1 %646  ;;  %v645_v2 = vpop.permute.xlu0 %644  ;;  %577 = vmatprep.mubr.bf16.mxu1 %v1178_v1 }
  0x92   : > { %v649_v4 = vsel %vm648_vm6, %v645_v2, %v647_v63  ;;  %v650_v5 = vsel %vm648_vm6, %v647_v63, %v645_v2  ;;  %1127 = vmatprep.subr.msk.bf16.mxu0 %vm334_vm3, %v591_v55 }
  0x93   : > { %1124 = vmatprep.subr.msk.bf16.mxu1 %vm334_vm3, %v535_v62  ;;  %v540_v10 = vsel %vm334_vm3, %v534_v61, 0  ;;  %v664_v11 = vmul.f32 %v657_v54, %v649_v4  ;;  %v665_v12 = vmul.f32 %v661_v59, %v650_v5 }
  0x94   : > { %560 = vmatpush1.bf16.msra.mxu1 %v540_v10 }
  0x95   : > { %v668_v16 = vpack.c.bf16 %v664_v11, %v664_v11  ;;  %v669_v17 = vpack.c.bf16 %v665_v12, %v665_v12  ;;  %v725_v19 = vpop.permute.xlu1 %724  ;;  %v723_v20 = vpop.permute.xlu0 %722 }
  0x96   : > { %v727_v21 = vsel %vm726_vm7, %v723_v20, %v725_v19  ;;  %v728_v22 = vsel %vm726_vm7, %v725_v19, %v723_v20 }
  0x97   : > { %1121 = vmatmul.mubr.msk.bf16.vlgmr.msra.gmra.mxu0 %vm330_vm5, %v1119_v14  ;;  %1125 = vmatmul.mubr.msk.bf16.vlgmr.msra.gmra.mxu1 %vm330_vm5, %v1123_v15  ;;  %v742_v24 = vmul.f32 %v735_v9, %v727_v21  ;;  %v743_v25 = vmul.f32 %v739_v0, %v728_v22  ;;  %v674_v26 = vsel %vm334_vm3, %v668_v16, 0 }
  0x98   : > { %616 = vmatpush1.bf16.msra.mxu0 %v596_v18  ;;  %1131 = vmatprep.subr.msk.bf16.mxu1 %vm334_vm3, %v669_v17 }
  0x99   : > { %v746_v29 = vpack.c.bf16 %v742_v24, %v742_v24  ;;  %v747_v30 = vpack.c.bf16 %v743_v25, %v743_v25  ;;  %694 = vmatpush1.bf16.msra.mxu1 %v674_v26  ;;  %v803_v31 = vpop.permute.xlu1 %802  ;;  %v801_v32 = vpop.permute.xlu0 %800  ;;  %633 = vmatprep.mubr.bf16.mxu0 %v1178_v1 }
  0x9a   : > { %v805_v33 = vsel %vm804_vm8, %v801_v32, %v803_v31  ;;  %v806_v34 = vsel %vm804_vm8, %v803_v31, %v801_v32  ;;  %711 = vmatprep.mubr.bf16.mxu1 %v1178_v1 }
  0x9b   : > { %v820_v35 = vmul.f32 %v813_v23, %v805_v33  ;;  %v821_v36 = vmul.f32 %v817_v27, %v806_v34  ;;  %1135 = vmatprep.subr.msk.bf16.mxu0 %vm334_vm3, %v747_v30  ;;  %v752_v6 = vsel %vm334_vm3, %v746_v29, 0 }
  0x9d   : > { %v824_v41 = vpack.c.bf16 %v820_v35, %v820_v35  ;;  %v825_v42 = vpack.c.bf16 %v821_v36, %v821_v36  ;;  %v881_v43 = vpop.permute.xlu1 %880  ;;  %v879_v44 = vpop.permute.xlu0 %878 }
  0x9e   : > { %v883_v45 = vsel %vm882_vm9, %v879_v44, %v881_v43  ;;  %v884_v46 = vsel %vm882_vm9, %v881_v43, %v879_v44 }
  0x9f   : > { %1128 = vmatmul.mubr.msk.bf16.vlgmr.msra.gmra.mxu0 %vm330_vm5, %v1126_v39  ;;  %1132 = vmatmul.mubr.msk.bf16.vlgmr.msra.gmra.mxu1 %vm330_vm5, %v1130_v40  ;;  %v898_v7 = vmul.f32 %v891_v37, %v883_v45  ;;  %v899_v8 = vmul.f32 %v895_v38, %v884_v46  ;;  %v830_v47 = vsel %vm334_vm3, %v824_v41, 0 }
  0xa0   : > { %772 = vmatpush1.bf16.msra.mxu0 %v752_v6  ;;  %1139 = vmatprep.subr.msk.bf16.mxu1 %vm334_vm3, %v825_v42 }
  0xa1   : > { %v902_v48 = vpack.c.bf16 %v898_v7, %v898_v7  ;;  %v903_v49 = vpack.c.bf16 %v899_v8, %v899_v8  ;;  %850 = vmatpush1.bf16.msra.mxu1 %v830_v47  ;;  %789 = vmatprep.mubr.bf16.mxu0 %v1178_v1 }
  0xa2   : > { %867 = vmatprep.mubr.bf16.mxu1 %v1178_v1 }
  0xa3   : > { %1143 = vmatprep.subr.msk.bf16.mxu0 %vm334_vm3, %v903_v49  ;;  %v908_v52 = vsel %vm334_vm3, %v902_v48, 0 }
  0xa7   : > { %1136 = vmatmul.mubr.msk.bf16.vlgmr.msra.gmra.mxu0 %vm330_vm5, %v1134_v50  ;;  %1140 = vmatmul.mubr.msk.bf16.vlgmr.msra.gmra.mxu1 %vm330_vm5, %v1138_v51 }
  0xa8   : > { %928 = vmatpush1.bf16.msra.mxu0 %v908_v52  ;;  %945 = vmatprep.mubr.bf16.mxu0 %v1178_v1 }
  0xaa   : > { %v960_v39 = vpop.permute.xlu0 %959 }
  0xaf   : > { %1144 = vmatmul.mubr.msk.bf16.vlgmr.msra.gmra.mxu0 %vm330_vm5, %v1142_v53 }
 0x14f   : > { %v375_v54 = vpop.f32.mrf.mxu0  ;;  %v425_v55 = vpop.f32.mrf.mxu1 }
 0x150   : > { %v426_v5 = vadd.f32 %v425_v55, %v375_v54 }
 0x151   : > { %v377_v56 = vpop.f32.mrf.mxu0  ;;  %v427_v57 = vpop.f32.mrf.mxu1 }
 0x152   : > { %v428_v11 = vadd.f32 %v427_v57, %v377_v56 }
 0x153   : > { %v379_v58 = vpop.f32.mrf.mxu0  ;;  %v429_v59 = vpop.f32.mrf.mxu1 }
 0x155   : > { %v380_v60 = vpop.f32.mrf.mxu0  ;;  %v430_v61 = vpop.f32.mrf.mxu1 }
 0x157   : > { %v501_v62 = vpop.f32.mrf.mxu0  ;;  %v579_v63 = vpop.f32.mrf.mxu1 }
 0x158   : > { %v508_v12 = vadd.f32 %v501_v62, %v426_v5 }
 0x159   : > { %v503_v2 = vpop.f32.mrf.mxu0  ;;  %v581_v3 = vpop.f32.mrf.mxu1 }
 0x15a   : > { %v509_v14 = vadd.f32 %v503_v2, %v428_v11  ;;  %v586_v17 = vadd.f32 %v579_v63, %v508_v12 }
 0x15b   : > { %v505_v4 = vpop.f32.mrf.mxu0  ;;  %v583_v1 = vpop.f32.mrf.mxu1 }
 0x15c   : > { %v587_v20 = vadd.f32 %v581_v3, %v509_v14 }
 0x15d   : > { %v506_v9 = vpop.f32.mrf.mxu0  ;;  %v584_v10 = vpop.f32.mrf.mxu1 }
 0x15f   : > { %v635_v0 = vpop.f32.mrf.mxu0  ;;  %v713_v13 = vpop.f32.mrf.mxu1 }
 0x160   : > { %v642_v21 = vadd.f32 %v635_v0, %v586_v17 }
 0x161   : > { %v637_v15 = vpop.f32.mrf.mxu0  ;;  %v715_v16 = vpop.f32.mrf.mxu1 }
 0x162   : > { %v643_v24 = vadd.f32 %v637_v15, %v587_v20  ;;  %v720_v27 = vadd.f32 %v713_v13, %v642_v21 }
 0x163   : > { %v639_v18 = vpop.f32.mrf.mxu0  ;;  %v717_v19 = vpop.f32.mrf.mxu1 }
 0x164   : > { %v721_v30 = vadd.f32 %v715_v16, %v643_v24 }
 0x165   : > { %v640_v22 = vpop.f32.mrf.mxu0  ;;  %v718_v23 = vpop.f32.mrf.mxu1 }
 0x167   : > { %v791_v25 = vpop.f32.mrf.mxu0  ;;  %v869_v26 = vpop.f32.mrf.mxu1 }
 0x168   : > { %v798_v31 = vadd.f32 %v791_v25, %v720_v27 }
 0x169   : > { %v793_v28 = vpop.f32.mrf.mxu0  ;;  %v871_v29 = vpop.f32.mrf.mxu1 }
 0x16a   : > { %v799_v34 = vadd.f32 %v793_v28, %v721_v30  ;;  %v876_v37 = vadd.f32 %v869_v26, %v798_v31 }
 0x16b   : > { %v795_v32 = vpop.f32.mrf.mxu0  ;;  %v873_v33 = vpop.f32.mrf.mxu1 }
 0x16c   : > { %v877_v40 = vadd.f32 %v871_v29, %v799_v34 }
 0x16d   : > { %v796_v35 = vpop.f32.mrf.mxu0  ;;  %v874_v36 = vpop.f32.mrf.mxu1 }
 0x16f   : > { %v947_v38 = vpop.f32.mrf.mxu0 }
 0x170   : > { %v954_v41 = vadd.f32 %v947_v38, %v876_v37 }
 0x171   : > { %v949_v42 = vpop.f32.mrf.mxu0 }
 0x172   : > { %v962_v6 = vadd.f32 %v960_v39, %v954_v41  ;;  %v955_v43 = vadd.f32 %v949_v42, %v877_v40 }
 0x173   : > { %v951_v44 = vpop.f32.mrf.mxu0 }
 0x174   : > { %v963_v45 = vadd.f32 %v960_v39, %v955_v43  ;;  %v969_v47 = vmul.f32 %v962_v6, %v962_v6 }
 0x175   : > { %v952_v46 = vpop.f32.mrf.mxu0 }
 0x176   : > { %v1150_v7 = vpack.c.bf16 %v963_v45, %v962_v6  ;;  %v964_v8 = vadd.f32 %v963_v45, %v962_v6  ;;  %v970_v48 = vmul.f32 %v963_v45, %v963_v45 }
 0x178   : > { %983 = vst [vmem:[%s264_s29] sm:$0xff] %v1150_v7  ;;  %965 = vadd.xlane.f32.xlu1 %v964_v8  ;;  %v971_v49 = vadd.f32 %v970_v48, %v969_v47 }
 0x17a   : > { %972 = vadd.xlane.f32.xlu0 %v971_v49 }
 0x201   : > { %v966_v50 = vpop.xlane.xlu1 %965 }
 0x202   : > { %968 = vst.msk [vmem:[%s268_s8] sm:$0xff] %vm967_vm10, %v966_v50 }
 0x203   : > { %v973_v51 = vpop.xlane.xlu0 %972 }
 0x204   : > { %974 = vst.msk [vmem:[%s272_s11] sm:$0xff] %vm967_vm10, %v973_v51 }
 0x205 PF: > { %s17_s21 = sadd.s32 1, %s1176_s21  }
 0x206   : > { %p14_p4 = scmp.ge.s32.totalorder %s17_s21, 4  }
 0x208   :  { %16 = sbr.rel (!%p14_p4) target bundleno = 1 (0x1), region = 105 }

// kernel: vgg_block_pallas.3
= control target key start
LH: loop header
LB: loop body
LE: loop exit
PB: predicated region body
PF: predicated region fallthrough
CT: control target
= control target key end

     0   :  { %s1293_s27 = smov 0   ;;  %s1496_s0 = inlined_call_operand.vmem [shape: bf16[2,8,256], index: 0, kind: input, shape index: {}]   ;;  %s1497_s1 = inlined_call_operand.vmem [shape: f32[8,1], index: 1, kind: input, shape index: {}]   ;;  %s1498_s2 = inlined_call_operand.vmem [shape: f32[8,1], index: 2, kind: input, shape index: {}]   ;;  %s1499_s3 = inlined_call_operand.vmem [shape: bf16[9,8,8], index: 3, kind: input, shape index: {}]   ;;  %s1500_s4 = inlined_call_operand.vmem [shape: f32[8,1], index: 4, kind: input, shape index: {}]   ;;  %s1501_s5 = inlined_call_operand.vmem [shape: f32[9,1,256], index: 5, kind: input, shape index: {}]   ;;  %s1502_s6 = inlined_call_operand.vmem [shape: f32[2,8,256], index: 6, kind: output, shape index: {0}]   ;;  %s1503_s7 = inlined_call_operand.vmem [shape: f32[2,8,1], index: 7, kind: output, shape index: {1}]   ;;  %s1504_s8 = inlined_call_operand.vmem [shape: f32[2,8,1], index: 8, kind: output, shape index: {2}]  }
   0x1 LB: > { %s1165_s28 = sadd.s32 4294967295, %s1237_s27   ;;  %p1169_p0 = scmp.ge.s32.totalorder %s1237_s27, 1  ;;  %s1237_s27 = sphi %s1293_s27, %s19_s27  }
   0x2   : > { %p267_p1 = scmp.lt.s32.totalorder %s1237_s27, 3 }
   0x4   : > { %p268_p2 = pnand %p1169_p0, %p267_p1 }
   0x5   : > { %p309_p3 = scmp.lt.s32.totalorder (!%p268_p2), %s1165_s28, 1  ;;  %s1240_s15 = smov (!%p268_p2), 17  }
   0x6   : > { %271 = sbr.rel (%p268_p2) target bundleno = 647 (0x287), region = 44  ;;  %s1241_s16 = smov (!%p268_p2), 16  }
   0x7   : > { %s1242_s17 = smov (!%p268_p2), 15   ;;  %s1243_s18 = smov (!%p268_p2), 1  }
   0x8   : > { %s1244_s19 = smov (!%p268_p2), 127   ;;  %s1245_s20 = smov (!%p268_p2), 113  }
   0x9   : > { %s1246_s21 = smov (!%p268_p2), 112   ;;  %s1247_s22 = smov (!%p268_p2), 111  }
   0xb   : > { %v331_v0 = vld [vmem:[%s1497_s1] sm:$0xff]  ;;  %v1239_v1 = vmov 0   ;;  %s1506_s28 = smov (!%p309_p3, %s1165_s28), 1  ;;  %v353_v15 = vlaneseq  ;;  %vm405_vm2 = vcmask 1043456   ;;  %vm401_vm4 = vcmask 64512  }
   0xc   : > { %1230 = vset.pattern.permute.xlu0 %v1239_v1  ;;  %444 = vmatprep.mubr.bf16.mxu0 %v1239_v1  ;;  %v339_v2 = vld [vmem:[%s1498_s2] sm:$0xff]  ;;  %s1313_s11 = sshll.u32 %s1506_s28, 3  ;;  %v1193_v59 = vld [vmem:[%s1501_s5 + $0xa] sm:$0x3]  ;;  %vm1038_vm10 = vcmask 7168  }
   0xd   : > { %334 = vperm.xlu0 %1230, %v331_v0   ;;  %494 = vmatprep.mubr.bf16.mxu1 %v1239_v1  ;;  %s313_s14 = scalar_lea.vmem %s1496_s0, %s1313_s11  ;;  %v1027_v14 = vld [vmem:[%s1500_s4] sm:$0xff]  ;;  %v361_v16 = vshrl.u32 %v353_v15, 7  ;;  %v1342_v17 = vand.u32 127, %v353_v15  ;;  %s322_s26 = scalar_lea.vmem %s1503_s7, %s1313_s11 }
   0xe   : > { %v328_v3 = vld [vmem:[%s313_s14] sm:$0xff]  ;;  %s326_s9 = scalar_lea.vmem %s1504_s8, %s1313_s11 }
   0xf   : > { %v329_v4 = vunpack.c.l.bf16 %v328_v3  ;;  %v330_v6 = vunpack.c.h.bf16 %v328_v3  ;;  %v1344_v18 = vsub.s32 0, %v361_v16  ;;  %v1346_v19 = vsub.s32 1, %v361_v16  ;;  %v1176_v20 = vld [vmem:[%s1501_s5 + $0x2] sm:$0x3]  ;;  %v358_v25 = vld [vmem:[%s1501_s5] sm:$0x3] }
  0x10   : > { %vm379_vm0 = vcmp.lt.s32.totalorder %v1342_v17, 16  ;;  %vm355_vm1 = vcmp.lt.s32.totalorder %v1342_v17, 17  ;;  %v1182_v33 = vld [vmem:[%s1501_s5 + $0x4] sm:$0x3]  ;;  %vm507_vm3 = vcmp.lt.s32.totalorder %v1342_v17, 15  ;;  %vm585_vm5 = vcmp.lt.s32.totalorder %v1342_v17, 1 }
  0x11   : > { %342 = vperm.xlu0 %1230, %v339_v2   ;;  %v388_v23 = vrot.slane %v1176_v20, %v1344_v18  ;;  %v392_v24 = vrot.slane %v1176_v20, %v1346_v19  ;;  %v363_v31 = vrot.slane %v358_v25, %v1344_v18  ;;  %v367_v34 = vrot.slane %v358_v25, %v1346_v19  ;;  %v1186_v46 = vld [vmem:[%s1501_s5 + $0x6] sm:$0x3]  ;;  %v372_v60 = vld [vmem:[%s1499_s3] sm:$0xf] }
  0x12   : > { %v516_v41 = vrot.slane %v1182_v33, %v1344_v18  ;;  %v520_v44 = vrot.slane %v1182_v33, %v1346_v19  ;;  %v1177_v47 = vld [vmem:[%s1499_s3 + $0x4] sm:$0xf]  ;;  %v594_v53 = vrot.slane %v1186_v46, %v1344_v18  ;;  %v598_v58 = vrot.slane %v1186_v46, %v1346_v19 }
  0x13   : > { %vm719_vm6 = vcmp.lt.s32.totalorder %v1342_v17, 127  ;;  %vm797_vm7 = vcmp.lt.s32.totalorder %v1342_v17, 113  ;;  %vm875_vm8 = vcmp.lt.s32.totalorder %v1342_v17, 112  ;;  %vm953_vm9 = vcmp.lt.s32.totalorder %v1342_v17, 111 }
  0x88   : > { %v335_v5 = vpop.permute.xlu0 %334 }
  0x89   : > { %v337_v7 = vmul.f32 %v335_v5, %v329_v4  ;;  %v338_v9 = vmul.f32 %v335_v5, %v330_v6  ;;  %v728_v5 = vrot.slane %v1193_v59, %v1344_v18 }
  0x8c   : > { %v343_v8 = vpop.permute.xlu0 %342 }
  0x8d   : > { %v345_v10 = vadd.f32 %v343_v8, %v337_v7  ;;  %v346_v11 = vadd.f32 %v343_v8, %v338_v9  ;;  %v732_v9 = vrot.slane %v1193_v59, %v1346_v19 }
  0x8f   : > { %v1319_v12 = vmax.f32 %v345_v10, 0.0  ;;  %v1323_v13 = vmax.f32 %v346_v11, 0.0  ;;  %v1197_v10 = vld [vmem:[%s1501_s5 + $0xc] sm:$0x3]  ;;  %v1183_v11 = vld [vmem:[%s1499_s3 + $0x8] sm:$0xf] }
  0x91   : > { %349 = vrot.lane.b32.xlu0 %v1319_v12, %s1240_s15  ;;  %375 = vrot.lane.b32.xlu1 %v1319_v12, %s1241_s16  ;;  %v662_v0 = vpack.c.bf16 %v1323_v13, %v1323_v13  ;;  %v661_v2 = vpack.c.bf16 %v1319_v12, %v1319_v12 }
  0x93   : > { %v667_v16 = vsel %vm405_vm2, %v661_v2, 0 }
  0x95   : > { %503 = vrot.lane.b32.xlu0 %v1319_v12, %s1242_s17  ;;  %377 = vrot.lane.b32.xlu1 %v1323_v13, %s1241_s16 }
  0x99   : > { %581 = vrot.lane.b32.xlu0 %v1319_v12, %s1243_s18  ;;  %351 = vrot.lane.b32.xlu1 %v1323_v13, %s1240_s15 }
  0x9d   : > { %715 = vrot.lane.b32.xlu0 %v1319_v12, %s1244_s19  ;;  %505 = vrot.lane.b32.xlu1 %v1323_v13, %s1242_s17 }
  0xa1   : > { %793 = vrot.lane.b32.xlu0 %v1319_v12, %s1245_s20  ;;  %583 = vrot.lane.b32.xlu1 %v1323_v13, %s1243_s18 }
  0xa5   : > { %871 = vrot.lane.b32.xlu0 %v1319_v12, %s1246_s21  ;;  %717 = vrot.lane.b32.xlu1 %v1323_v13, %s1244_s19 }
  0xa9   : > { %949 = vrot.lane.b32.xlu0 %v1319_v12, %s1247_s22  ;;  %795 = vrot.lane.b32.xlu1 %v1323_v13, %s1245_s20 }
  0xad   : > { %1030 = vperm.xlu0 %1230, %v1027_v14   ;;  %873 = vrot.lane.b32.xlu1 %v1323_v13, %s1246_s21  ;;  %s1212_s21 = sshll.u32 %s1506_s28, 4 }
  0xae   : > { %s318_s24 = scalar_lea.vmem %s1502_s6, %s1212_s21 }
  0xb1   : > { %951 = vrot.lane.b32.xlu1 %v1323_v13, %s1247_s22 }
 0x103   : > { %v350_v21 = vpop.permute.xlu0 %349  ;;  %v376_v22 = vpop.permute.xlu1 %375 }
 0x107   : > { %v504_v26 = vpop.permute.xlu0 %503  ;;  %v378_v27 = vpop.permute.xlu1 %377 }
 0x108   : > { %v380_v28 = vsel %vm379_vm0, %v376_v22, %v378_v27  ;;  %v381_v29 = vsel %vm379_vm0, %v378_v27, %v376_v22  ;;  %v806_v22 = vrot.slane %v1197_v10, %v1344_v18  ;;  %v1201_v27 = vld [vmem:[%s1501_s5 + $0xe] sm:$0x3] }
 0x109   : > { %v395_v30 = vmul.f32 %v388_v23, %v381_v29  ;;  %v396_v32 = vmul.f32 %v392_v24, %v380_v28  ;;  %v1187_v28 = vld [vmem:[%s1499_s3 + $0xc] sm:$0xf] }
 0x10b   : > { %v582_v35 = vpop.permute.xlu0 %581  ;;  %v352_v36 = vpop.permute.xlu1 %351  ;;  %v400_v37 = vpack.c.bf16 %v396_v32, %v396_v32  ;;  %v399_v38 = vpack.c.bf16 %v395_v30, %v395_v30 }
 0x10c   : > { %v356_v39 = vsel %vm355_vm1, %v350_v21, %v352_v36  ;;  %v357_v40 = vsel %vm355_vm1, %v352_v36, %v350_v21 }
 0x10d   : > { %v370_v42 = vmul.f32 %v363_v31, %v357_v40  ;;  %1178 = vmatprep.subr.msk.bf16.mxu0 %vm405_vm2, %v400_v37  ;;  %v407_v43 = vsel %vm405_vm2, %v399_v38, 0  ;;  %v371_v45 = vmul.f32 %v367_v34, %v356_v39  ;;  %v884_v34 = vrot.slane %v1201_v27, %v1344_v18  ;;  %v1205_v40 = vld [vmem:[%s1501_s5 + $0x10] sm:$0x3] }
 0x10e   : > { %427 = vmatpush1.bf16.msra.mxu0 %v407_v43  ;;  %v888_v39 = vrot.slane %v1201_v27, %v1346_v19 }
 0x10f   : > { %v506_v48 = vpop.permute.xlu1 %505  ;;  %v374_v49 = vpack.c.bf16 %v371_v45, %v371_v45  ;;  %v373_v50 = vpack.c.bf16 %v370_v42, %v370_v42  ;;  %v716_v54 = vpop.permute.xlu0 %715 }
 0x110   : > { %v508_v51 = vsel %vm507_vm3, %v504_v26, %v506_v48  ;;  %v509_v52 = vsel %vm507_vm3, %v506_v48, %v504_v26  ;;  %v810_v26 = vrot.slane %v1197_v10, %v1346_v19 }
 0x111   : > { %v523_v55 = vmul.f32 %v516_v41, %v509_v52  ;;  %v524_v56 = vmul.f32 %v520_v44, %v508_v51  ;;  %1179 = vmatmul.mubr.msk.bf16.vlgmr.msra.gmra.mxu0 %vm401_vm4, %v1177_v47  ;;  %1180 = vmatprep.subr.msk.bf16.mxu1 %vm405_vm2, %v374_v49  ;;  %v457_v57 = vsel %vm405_vm2, %v373_v50, 0  ;;  %v1190_v41 = vld [vmem:[%s1499_s3 + $0x10] sm:$0xf]  ;;  %v962_v47 = vrot.slane %v1205_v40, %v1344_v18  ;;  %v1194_v52 = vld [vmem:[%s1499_s3 + $0x14] sm:$0xf] }
 0x112   : > { %477 = vmatpush1.bf16.msra.mxu1 %v457_v57  ;;  %570 = vmatprep.mubr.bf16.mxu0 %v1239_v1  ;;  %v966_v51 = vrot.slane %v1205_v40, %v1346_v19 }
 0x113   : > { %v527_v61 = vpack.c.bf16 %v523_v55, %v523_v55  ;;  %v528_v62 = vpack.c.bf16 %v524_v56, %v524_v56  ;;  %v584_v63 = vpop.permute.xlu1 %583  ;;  %v794_v12 = vpop.permute.xlu0 %793 }
 0x114   : > { %v586_v3 = vsel %vm585_vm5, %v582_v35, %v584_v63  ;;  %v587_v4 = vsel %vm585_vm5, %v584_v63, %v582_v35  ;;  %v1202_v63 = vld [vmem:[%s1499_s3 + $0x1c] sm:$0xf] }
 0x115   : > { %v601_v6 = vmul.f32 %v594_v53, %v587_v4  ;;  %v602_v7 = vmul.f32 %v598_v58, %v586_v3  ;;  %1181 = vmatmul.mubr.msk.bf16.vlgmr.msra.gmra.mxu1 %vm401_vm4, %v372_v60  ;;  %1184 = vmatprep.subr.msk.bf16.mxu0 %vm405_vm2, %v528_v62  ;;  %v533_v8 = vsel %vm405_vm2, %v527_v61, 0  ;;  %v1198_v60 = vld [vmem:[%s1499_s3 + $0x18] sm:$0xf] }
 0x116   : > { %553 = vmatpush1.bf16.msra.mxu0 %v533_v8  ;;  %648 = vmatprep.mubr.bf16.mxu1 %v1239_v1 }
 0x117   : > { %v605_v13 = vpack.c.bf16 %v601_v6, %v601_v6  ;;  %v606_v14 = vpack.c.bf16 %v602_v7, %v602_v7  ;;  %1191 = vmatprep.subr.msk.bf16.mxu0 %vm405_vm2, %v662_v0  ;;  %v718_v15 = vpop.permute.xlu1 %717  ;;  %v872_v35 = vpop.permute.xlu0 %871  ;;  %v1206_v0 = vld [vmem:[%s1499_s3 + $0x20] sm:$0xf] }
 0x118   : > { %v720_v20 = vsel %vm719_vm6, %v716_v54, %v718_v15  ;;  %v721_v21 = vsel %vm719_vm6, %v718_v15, %v716_v54 }
 0x119   : > { %v735_v23 = vmul.f32 %v728_v5, %v720_v20  ;;  %v736_v24 = vmul.f32 %v732_v9, %v721_v21  ;;  %1185 = vmatmul.mubr.msk.bf16.vlgmr.msra.gmra.mxu0 %vm401_vm4, %v1183_v11  ;;  %1188 = vmatprep.subr.msk.bf16.mxu1 %vm405_vm2, %v606_v14  ;;  %v611_v25 = vsel %vm405_vm2, %v605_v13, 0 }
 0x11a   : > { %631 = vmatpush1.bf16.msra.mxu1 %v611_v25  ;;  %687 = vmatpush1.bf16.msra.mxu0 %v667_v16 }
 0x11b   : > { %v739_v29 = vpack.c.bf16 %v735_v23, %v735_v23  ;;  %v740_v30 = vpack.c.bf16 %v736_v24, %v736_v24  ;;  %v796_v31 = vpop.permute.xlu1 %795  ;;  %704 = vmatprep.mubr.bf16.mxu0 %v1239_v1  ;;  %v950_v53 = vpop.permute.xlu0 %949 }
 0x11c   : > { %v798_v32 = vsel %vm797_vm7, %v794_v12, %v796_v31  ;;  %v799_v33 = vsel %vm797_vm7, %v796_v31, %v794_v12 }
 0x11d   : > { %v813_v36 = vmul.f32 %v806_v22, %v798_v32  ;;  %v814_v37 = vmul.f32 %v810_v26, %v799_v33  ;;  %1189 = vmatmul.mubr.msk.bf16.vlgmr.msra.gmra.mxu1 %vm401_vm4, %v1187_v28  ;;  %1195 = vmatprep.subr.msk.bf16.mxu1 %vm405_vm2, %v740_v30  ;;  %v745_v38 = vsel %vm405_vm2, %v739_v29, 0 }
 0x11e   : > { %765 = vmatpush1.bf16.msra.mxu1 %v745_v38  ;;  %782 = vmatprep.mubr.bf16.mxu1 %v1239_v1 }
 0x11f   : > { %v817_v42 = vpack.c.bf16 %v813_v36, %v813_v36  ;;  %v818_v43 = vpack.c.bf16 %v814_v37, %v814_v37  ;;  %v874_v44 = vpop.permute.xlu1 %873 }
 0x120   : > { %v876_v45 = vsel %vm875_vm8, %v872_v35, %v874_v44  ;;  %v877_v46 = vsel %vm875_vm8, %v874_v44, %v872_v35 }
 0x121   : > { %v891_v48 = vmul.f32 %v884_v34, %v876_v45  ;;  %v892_v49 = vmul.f32 %v888_v39, %v877_v46  ;;  %1192 = vmatmul.mubr.msk.bf16.vlgmr.msra.gmra.mxu0 %vm401_vm4, %v1190_v41  ;;  %1199 = vmatprep.subr.msk.bf16.mxu0 %vm405_vm2, %v818_v43  ;;  %v823_v50 = vsel %vm405_vm2, %v817_v42, 0 }
 0x122   : > { %843 = vmatpush1.bf16.msra.mxu0 %v823_v50  ;;  %860 = vmatprep.mubr.bf16.mxu0 %v1239_v1 }
 0x123   : > { %v895_v54 = vpack.c.bf16 %v891_v48, %v891_v48  ;;  %v896_v18 = vpack.c.bf16 %v892_v49, %v892_v49  ;;  %v952_v55 = vpop.permute.xlu1 %951 }
 0x124   : > { %v954_v56 = vsel %vm953_vm9, %v950_v53, %v952_v55  ;;  %v955_v57 = vsel %vm953_vm9, %v952_v55, %v950_v53 }
 0x125   : > { %v969_v58 = vmul.f32 %v962_v47, %v954_v56  ;;  %v970_v59 = vmul.f32 %v966_v51, %v955_v57  ;;  %1196 = vmatmul.mubr.msk.bf16.vlgmr.msra.gmra.mxu1 %vm401_vm4, %v1194_v52  ;;  %1203 = vmatprep.subr.msk.bf16.mxu1 %vm405_vm2, %v896_v18  ;;  %v901_v19 = vsel %vm405_vm2, %v895_v54, 0 }
 0x126   : > { %921 = vmatpush1.bf16.msra.mxu1 %v901_v19  ;;  %938 = vmatprep.mubr.bf16.mxu1 %v1239_v1 }
 0x127   : > { %v973_v61 = vpack.c.bf16 %v969_v58, %v969_v58  ;;  %v974_v62 = vpack.c.bf16 %v970_v59, %v970_v59 }
 0x128   : > { %v1031_v49 = vpop.permute.xlu0 %1030 }
 0x129   : > { %1200 = vmatmul.mubr.msk.bf16.vlgmr.msra.gmra.mxu0 %vm401_vm4, %v1198_v60  ;;  %1207 = vmatprep.subr.msk.bf16.mxu0 %vm405_vm2, %v974_v62  ;;  %v979_v17 = vsel %vm405_vm2, %v973_v61, 0 }
 0x12a   : > { %999 = vmatpush1.bf16.msra.mxu0 %v979_v17  ;;  %1016 = vmatprep.mubr.bf16.mxu0 %v1239_v1 }
 0x12d   : > { %1204 = vmatmul.mubr.msk.bf16.vlgmr.msra.gmra.mxu1 %vm401_vm4, %v1202_v63 }
 0x131   : > { %1208 = vmatmul.mubr.msk.bf16.vlgmr.msra.gmra.mxu0 %vm401_vm4, %v1206_v0 }
 0x1d1   : > { %v446_v2 = vpop.f32.mrf.mxu0 }
 0x1d3   : > { %v448_v3 = vpop.f32.mrf.mxu0 }
 0x1d5   : > { %v450_v4 = vpop.f32.mrf.mxu0  ;;  %v496_v5 = vpop.f32.mrf.mxu1 }
 0x1d6   : > { %v497_v22 = vadd.f32 %v496_v5, %v446_v2 }
 0x1d7   : > { %v451_v6 = vpop.f32.mrf.mxu0  ;;  %v498_v7 = vpop.f32.mrf.mxu1 }
 0x1d8   : > { %v499_v25 = vadd.f32 %v498_v7, %v448_v3 }
 0x1d9   : > { %v500_v8 = vpop.f32.mrf.mxu1  ;;  %v572_v9 = vpop.f32.mrf.mxu0 }
 0x1da   : > { %v579_v26 = vadd.f32 %v572_v9, %v497_v22 }
 0x1db   : > { %v501_v10 = vpop.f32.mrf.mxu1  ;;  %v574_v11 = vpop.f32.mrf.mxu0 }
 0x1dc   : > { %v580_v29 = vadd.f32 %v574_v11, %v499_v25 }
 0x1dd   : > { %v576_v12 = vpop.f32.mrf.mxu0  ;;  %v650_v1 = vpop.f32.mrf.mxu1 }
 0x1de   : > { %v657_v30 = vadd.f32 %v650_v1, %v579_v26 }
 0x1df   : > { %v577_v13 = vpop.f32.mrf.mxu0  ;;  %v652_v14 = vpop.f32.mrf.mxu1 }
 0x1e0   : > { %v658_v33 = vadd.f32 %v652_v14, %v580_v29 }
 0x1e1   : > { %v654_v15 = vpop.f32.mrf.mxu1  ;;  %v706_v16 = vpop.f32.mrf.mxu0 }
 0x1e2   : > { %v713_v34 = vadd.f32 %v706_v16, %v657_v30 }
 0x1e3   : > { %v655_v20 = vpop.f32.mrf.mxu1  ;;  %v708_v21 = vpop.f32.mrf.mxu0 }
 0x1e4   : > { %v714_v37 = vadd.f32 %v708_v21, %v658_v33 }
 0x1e5   : > { %v710_v23 = vpop.f32.mrf.mxu0  ;;  %v784_v24 = vpop.f32.mrf.mxu1 }
 0x1e6   : > { %v791_v38 = vadd.f32 %v784_v24, %v713_v34 }
 0x1e7   : > { %v711_v27 = vpop.f32.mrf.mxu0  ;;  %v786_v28 = vpop.f32.mrf.mxu1 }
 0x1e8   : > { %v792_v41 = vadd.f32 %v786_v28, %v714_v37 }
 0x1e9   : > { %v788_v31 = vpop.f32.mrf.mxu1  ;;  %v862_v32 = vpop.f32.mrf.mxu0 }
 0x1ea   : > { %v869_v42 = vadd.f32 %v862_v32, %v791_v38 }
 0x1eb   : > { %v789_v35 = vpop.f32.mrf.mxu1  ;;  %v864_v36 = vpop.f32.mrf.mxu0 }
 0x1ec   : > { %v870_v45 = vadd.f32 %v864_v36, %v792_v41 }
 0x1ed   : > { %v866_v39 = vpop.f32.mrf.mxu0  ;;  %v940_v40 = vpop.f32.mrf.mxu1 }
 0x1ee   : > { %v947_v46 = vadd.f32 %v940_v40, %v869_v42 }
 0x1ef   : > { %v867_v43 = vpop.f32.mrf.mxu0  ;;  %v942_v44 = vpop.f32.mrf.mxu1 }
 0x1f0   : > { %v948_v50 = vadd.f32 %v942_v44, %v870_v45 }
 0x1f1   : > { %v1018_v47 = vpop.f32.mrf.mxu0  ;;  %v944_v48 = vpop.f32.mrf.mxu1 }
 0x1f2   : > { %v1025_v51 = vadd.f32 %v1018_v47, %v947_v46 }
 0x1f3   : > { %v1020_v52 = vpop.f32.mrf.mxu0  ;;  %v945_v53 = vpop.f32.mrf.mxu1 }
 0x1f4   : > { %v1033_v54 = vadd.f32 %v1031_v49, %v1025_v51  ;;  %v1026_v18 = vadd.f32 %v1020_v52, %v948_v50 }
 0x1f5   : > { %v1022_v55 = vpop.f32.mrf.mxu0 }
 0x1f6   : > { %1046 = vst [vmem:[%s318_s24] sm:$0xff] %v1033_v54  ;;  %v1034_v56 = vadd.f32 %v1031_v49, %v1026_v18  ;;  %v1040_v59 = vmul.f32 %v1033_v54, %v1033_v54 }
 0x1f7   : > { %v1023_v57 = vpop.f32.mrf.mxu0 }
 0x1f8   : > { %1047 = vst [vmem:[%s318_s24 + $0x8] sm:$0xff] %v1034_v56  ;;  %v1035_v58 = vadd.f32 %v1034_v56, %v1033_v54  ;;  %v1041_v19 = vmul.f32 %v1034_v56, %v1034_v56 }
 0x1fa   : > { %1036 = vadd.xlane.f32.xlu1 %v1035_v58  ;;  %v1042_v60 = vadd.f32 %v1041_v19, %v1040_v59 }
 0x1fc   : > { %1043 = vadd.xlane.f32.xlu0 %v1042_v60 }
 0x283   : > { %v1037_v61 = vpop.xlane.xlu1 %1036 }
 0x284   : > { %1039 = vst.msk [vmem:[%s322_s26] sm:$0xff] %vm1038_vm10, %v1037_v61 }
 0x285   : > { %v1044_v62 = vpop.xlane.xlu0 %1043 }
 0x286   : > { %1045 = vst.msk [vmem:[%s326_s9] sm:$0xff] %vm1038_vm10, %v1044_v62 }
 0x287 PF: > { %s19_s27 = sadd.s32 1, %s1237_s27  }
 0x288   : > { %p16_p4 = scmp.ge.s32.totalorder %s19_s27, 4  }
 0x28a   :  { %18 = sbr.rel (!%p16_p4) target bundleno = 1 (0x1), region = 113 }

</bundles_post_ra>
